<compile_context>
chip_gen: v5e
topology: v5e:2x2
jax: 0.10.0
libtpu: 0.0.40
codegen_flags: <defaults>
</compile_context>

<pallas_src>
import functools

import jax
import jax.numpy as jnp
from jax.experimental import pallas as pl
from jax.experimental.pallas import tpu as pltpu


def _conv_bn_relu_kernel(x_ref, w_ref, shift_ref, o_ref, *, kh, kw, pad):
    """One grid step = one batch element.

    x_ref:     (1, H, W, Cin)      unpadded input tile (VMEM)
    w_ref:     (KH*KW*Cin, Cpad)   BN-folded, channel-padded conv weights
    shift_ref: (1, Cpad)           folded conv-bias + BN shift (f32)
    o_ref:     (1, Ho*Wo, Cpad)    lane-dense (Cpad % 128 == 0) output tile
    """
    _, H, W, Cin = x_ref.shape
    Hp, Wp = H + 2 * pad, W + 2 * pad
    Ho, Wo = Hp - kh + 1, Wp - kw + 1

    x = x_ref[0]                                            # (H, W, Cin)
    if pad:
        # Zero-pad the halo in VMEM — no padded HBM copy of the activation.
        zr = jnp.zeros((pad, W, Cin), x.dtype)
        x = jnp.concatenate([zr, x, zr], axis=0)            # (Hp, W, Cin)
        zc = jnp.zeros((Hp, pad, Cin), x.dtype)
        x = jnp.concatenate([zc, x, zc], axis=1)            # (Hp, Wp, Cin)

    # im2col: concat the KH*KW shifted views along channels, flatten spatial
    # dims into the matmul M dimension.
    taps = [x[i:i + Ho, j:j + Wo, :] for i in range(kh) for j in range(kw)]
    patches = jnp.concatenate(taps, axis=-1)                # (Ho, Wo, KH*KW*Cin)
    patches = patches.reshape(Ho * Wo, kh * kw * Cin)

    # Single MXU contraction with f32 accumulation.
    acc = jnp.dot(patches.astype(w_ref.dtype), w_ref[...],
                  preferred_element_type=jnp.float32)       # (Ho*Wo, Cpad)

    # Folded bias + BatchNorm + ReLU epilogue (f32).
    y = jnp.maximum(acc + shift_ref[...], 0.0)
    o_ref[0] = y.astype(o_ref.dtype)


def basic_conv2d(x_nchw, weight, bias, gamma, beta, running_mean, running_var,
                 *, padding=1, eps=1e-5, compute_dtype=None):
    """Conv2d(stride=1) + BatchNorm2d(eval) + ReLU.

    x_nchw: (N, Cin, H, W) float32, PyTorch NCHW convention.
    weight: (Cout, Cin, KH, KW) PyTorch conv weight layout.
    compute_dtype: optional operand dtype for the matmul (e.g. jnp.bfloat16 on
                   v6e/v7x); accumulation is always f32.
    Returns (N, Cout, H_out, W_out) in NCHW, dtype of x_nchw.
    """
    N, Cin, H, W = x_nchw.shape
    Cout, _, KH, KW = weight.shape
    Hp, Wp = H + 2 * padding, W + 2 * padding
    Ho, Wo = Hp - KH + 1, Wp - KW + 1
    K = KH * KW * Cin
    Cpad = ((Cout + 127) // 128) * 128          # lane-dense output channels

    # ---- glue (plain JAX): layout conversion + BN / bias folding ----
    x = jnp.transpose(x_nchw, (0, 2, 3, 1))                      # NHWC
    scale = gamma / jnp.sqrt(running_var + eps)                  # (Cout,)
    w_hwio = jnp.transpose(weight, (2, 3, 1, 0))                 # (KH,KW,Cin,Cout)
    w_folded = (w_hwio * scale).reshape(K, Cout)                 # BN scale folded
    shift = bias * scale + beta - running_mean * scale           # (Cout,)

    w_pad = jnp.pad(w_folded, ((0, 0), (0, Cpad - Cout)))
    shift_pad = jnp.pad(shift, (0, Cpad - Cout)).reshape(1, Cpad)
    shift_pad = shift_pad.astype(jnp.float32)

    if compute_dtype is not None:                # bf16 operands on v6e / v7x
        x = x.astype(compute_dtype)
        w_pad = w_pad.astype(compute_dtype)

    kernel = functools.partial(_conv_bn_relu_kernel, kh=KH, kw=KW, pad=padding)

    out = pl.pallas_call(
        kernel,
        out_shape=jax.ShapeDtypeStruct((N, Ho * Wo, Cpad), x_nchw.dtype),
        grid_spec=pltpu.PrefetchScalarGridSpec(
            num_scalar_prefetch=0,
            grid=(N,),
            in_specs=[
                pl.BlockSpec((1, H, W, Cin), lambda n: (n, 0, 0, 0)),
                pl.BlockSpec((K, Cpad), lambda n: (0, 0)),
                pl.BlockSpec((1, Cpad), lambda n: (0, 0)),
            ],
            out_specs=pl.BlockSpec((1, Ho * Wo, Cpad), lambda n: (n, 0, 0)),
        ),
        compiler_params=pltpu.CompilerParams(
            dimension_semantics=("parallel",)),   # v7x: 2 TCs split the batch
    )(x, w_pad, shift_pad)

    out = out[:, :, :Cout].reshape(N, Ho, Wo, Cout)              # drop lane pad
    return jnp.transpose(out, (0, 3, 1, 2))                      # back to NCHW


def _reference(x_nchw, weight, bias, gamma, beta, running_mean, running_var,
               *, padding=1, eps=1e-5):
    y = jax.lax.conv_general_dilated(
        x_nchw, weight, window_strides=(1, 1),
        padding=((padding, padding), (padding, padding)),
        dimension_numbers=("NCHW", "OIHW", "NCHW"))
    y = y + bias[None, :, None, None]
    scale = gamma / jnp.sqrt(running_var + eps)
    shift = beta - running_mean * scale
    y = y * scale[None, :, None, None] + shift[None, :, None, None]
    return jnp.maximum(y, 0.0)


if __name__ == "__main__":
    # Module config: BasicConv2d(in_channels=4, out_channels=8,
    #                            kernel_size=3, padding=1)
    N, Cin, H, W = 2, 4, 16, 16
    Cout, KH, KW = 8, 3, 3

    key = jax.random.PRNGKey(0)
    k_x, k_w, k_b, k_g, k_be, k_m, k_v = jax.random.split(key, 7)

    x = jax.random.normal(k_x, (N, Cin, H, W), dtype=jnp.float32)
    weight = 0.1 * jax.random.normal(k_w, (Cout, Cin, KH, KW), dtype=jnp.float32)
    bias = 0.05 * jax.random.normal(k_b, (Cout,), dtype=jnp.float32)
    gamma = 1.0 + 0.1 * jax.random.normal(k_g, (Cout,), dtype=jnp.float32)
    beta = 0.1 * jax.random.normal(k_be, (Cout,), dtype=jnp.float32)
    running_mean = 0.1 * jax.random.normal(k_m, (Cout,), dtype=jnp.float32)
    running_var = 1.0 + 0.1 * jax.nn.softplus(
        jax.random.normal(k_v, (Cout,), dtype=jnp.float32))

    ref = _reference(x, weight, bias, gamma, beta, running_mean, running_var,
                     padding=1)

    # Default f32 path (matches PyTorch eval-mode numerics).
    out = basic_conv2d(x, weight, bias, gamma, beta, running_mean, running_var,
                       padding=1)
    out = jax.block_until_ready(out)
    assert out.shape == (N, Cout, H, W)
    assert jnp.allclose(out, ref, atol=1e-4, rtol=1e-4), "f32 mismatch vs reference"

    # bf16-operand path (v6e/v7x MXU-native, f32 accumulation) — loose tolerance.
    out_bf16 = basic_conv2d(x, weight, bias, gamma, beta, running_mean,
                            running_var, padding=1,
                            compute_dtype=jnp.bfloat16)
    out_bf16 = jax.block_until_ready(out_bf16)
    assert out_bf16.shape == (N, Cout, H, W)
    assert jnp.allclose(out_bf16, ref, atol=5e-2, rtol=5e-2), "bf16 mismatch vs reference"

    print("KERNEL_OK")
</pallas_src>

<mosaic_0001>
module attributes {stable_mosaic.version = 11 : i64} {
  func.func @_conv_bn_relu_kernel(%arg0: i32, %arg1: memref<1x16x16x4xf32, #tpu.memory_space<vmem>>, %arg2: memref<36x128xf32, #tpu.memory_space<vmem>>, %arg3: memref<1x128xf32, #tpu.memory_space<vmem>>, %arg4: memref<1x256x128xf32, #tpu.memory_space<vmem>>) attributes {dimension_semantics = [#tpu.dimension_semantics<parallel>], iteration_bounds = array<i64: 2>, scalar_prefetch = 0 : i64, scratch_operands = 0 : i64, tpu.core_type = #tpu.core_type<tc>, window_params = [{transform_indices = @transform_0, window_bounds = array<i64: 1, 16, 16, 4>}, {pipeline_mode = #tpu.pipeline_mode<synchronous>, transform_indices = @transform_1, window_bounds = array<i64: 36, 128>}, {pipeline_mode = #tpu.pipeline_mode<synchronous>, transform_indices = @transform_2, window_bounds = array<i64: 1, 128>}, {transform_indices = @transform_3, window_bounds = array<i64: 1, 256, 128>}]} {
    %c0 = arith.constant 0 : index
    %c0_0 = arith.constant 0 : index
    %c0_1 = arith.constant 0 : index
    %c0_2 = arith.constant 0 : index
    %0 = vector.load %arg1[%c0, %c0_0, %c0_1, %c0_2] : memref<1x16x16x4xf32, #tpu.memory_space<vmem>>, vector<1x16x16x4xf32>
    %1 = vector.shape_cast %0 : vector<1x16x16x4xf32> to vector<16x16x4xf32>
    %cst = arith.constant 0.000000e+00 : f32
    %2 = vector.broadcast %cst : f32 to vector<1x16x4xf32>
    %3 = tpu.concatenate %2, %1, %2 in 0 : vector<1x16x4xf32>, vector<16x16x4xf32>, vector<1x16x4xf32> -> vector<18x16x4xf32>
    %cst_3 = arith.constant 0.000000e+00 : f32
    %4 = vector.broadcast %cst_3 : f32 to vector<18x1x4xf32>
    %5 = tpu.concatenate %4, %3, %4 in 1 : vector<18x1x4xf32>, vector<18x16x4xf32>, vector<18x1x4xf32> -> vector<18x18x4xf32>
    %6 = vector.extract_strided_slice %5 {offsets = [0, 0, 0], sizes = [16, 16, 4], strides = [1, 1, 1]} : vector<18x18x4xf32> to vector<16x16x4xf32>
    %7 = vector.extract_strided_slice %5 {offsets = [0, 1, 0], sizes = [16, 16, 4], strides = [1, 1, 1]} : vector<18x18x4xf32> to vector<16x16x4xf32>
    %8 = vector.extract_strided_slice %5 {offsets = [0, 2, 0], sizes = [16, 16, 4], strides = [1, 1, 1]} : vector<18x18x4xf32> to vector<16x16x4xf32>
    %9 = vector.extract_strided_slice %5 {offsets = [1, 0, 0], sizes = [16, 16, 4], strides = [1, 1, 1]} : vector<18x18x4xf32> to vector<16x16x4xf32>
    %10 = vector.extract_strided_slice %5 {offsets = [1, 1, 0], sizes = [16, 16, 4], strides = [1, 1, 1]} : vector<18x18x4xf32> to vector<16x16x4xf32>
    %11 = vector.extract_strided_slice %5 {offsets = [1, 2, 0], sizes = [16, 16, 4], strides = [1, 1, 1]} : vector<18x18x4xf32> to vector<16x16x4xf32>
    %12 = vector.extract_strided_slice %5 {offsets = [2, 0, 0], sizes = [16, 16, 4], strides = [1, 1, 1]} : vector<18x18x4xf32> to vector<16x16x4xf32>
    %13 = vector.extract_strided_slice %5 {offsets = [2, 1, 0], sizes = [16, 16, 4], strides = [1, 1, 1]} : vector<18x18x4xf32> to vector<16x16x4xf32>
    %14 = vector.extract_strided_slice %5 {offsets = [2, 2, 0], sizes = [16, 16, 4], strides = [1, 1, 1]} : vector<18x18x4xf32> to vector<16x16x4xf32>
    %15 = tpu.concatenate %6, %7, %8, %9, %10, %11, %12, %13, %14 in 2 : vector<16x16x4xf32>, vector<16x16x4xf32>, vector<16x16x4xf32>, vector<16x16x4xf32>, vector<16x16x4xf32>, vector<16x16x4xf32>, vector<16x16x4xf32>, vector<16x16x4xf32>, vector<16x16x4xf32> -> vector<16x16x36xf32>
    %16 = vector.shape_cast %15 : vector<16x16x36xf32> to vector<256x36xf32>
    %c0_4 = arith.constant 0 : index
    %c0_5 = arith.constant 0 : index
    %17 = vector.load %arg2[%c0_4, %c0_5] : memref<36x128xf32, #tpu.memory_space<vmem>>, vector<36x128xf32>
    %cst_6 = arith.constant dense<0.000000e+00> : vector<256x128xf32>
    %18 = tpu.matmul %16, %17, %cst_6 {dimension_numbers = #tpu.dot_dimension_numbers<[1], [0], [0], [1], [0, 0, 1, 1], [], []>} : vector<256x36xf32>, vector<36x128xf32>, vector<256x128xf32> -> vector<256x128xf32>
    %c0_7 = arith.constant 0 : index
    %c0_8 = arith.constant 0 : index
    %19 = vector.load %arg3[%c0_7, %c0_8] : memref<1x128xf32, #tpu.memory_space<vmem>>, vector<1x128xf32>
    %20 = vector.broadcast %19 : vector<1x128xf32> to vector<256x128xf32>
    %21 = arith.addf %18, %20 : vector<256x128xf32>
    %cst_9 = arith.constant 0.000000e+00 : f32
    %22 = vector.broadcast %cst_9 : f32 to vector<256x128xf32>
    %23 = arith.maximumf %21, %22 : vector<256x128xf32>
    %c0_10 = arith.constant 0 : index
    %c0_11 = arith.constant 0 : index
    %c0_12 = arith.constant 0 : index
    %24 = vector.load %arg4[%c0_10, %c0_11, %c0_12] : memref<1x256x128xf32, #tpu.memory_space<vmem>>, vector<1x256x128xf32>
    %25 = vector.shape_cast %24 : vector<1x256x128xf32> to vector<256x128xf32>
    %26 = vector.shape_cast %23 : vector<256x128xf32> to vector<1x256x128xf32>
    tpu.vector_store %arg4[%c0_10, %c0_11, %c0_12], %26 {strides = array<i32>} : memref<1x256x128xf32, #tpu.memory_space<vmem>>, vector<1x256x128xf32>,
    return
  }
  func.func @transform_0(%arg0: i32) -> (i32, i32, i32, i32) {
    %c0_i32 = arith.constant 0 : i32
    %c0_i32_0 = arith.constant 0 : i32
    %c0_i32_1 = arith.constant 0 : i32
    %c0_i32_2 = arith.constant 0 : i32
    return %arg0, %c0_i32, %c0_i32_0, %c0_i32_1 : i32, i32, i32, i32
  }
  func.func @transform_1(%arg0: i32) -> (i32, i32) {
    %c0_i32 = arith.constant 0 : i32
    %c0_i32_0 = arith.constant 0 : i32
    %c0_i32_1 = arith.constant 0 : i32
    return %c0_i32, %c0_i32_0 : i32, i32
  }
  func.func @transform_2(%arg0: i32) -> (i32, i32) {
    %c0_i32 = arith.constant 0 : i32
    %c0_i32_0 = arith.constant 0 : i32
    %c0_i32_1 = arith.constant 0 : i32
    return %c0_i32, %c0_i32_0 : i32, i32
  }
  func.func @transform_3(%arg0: i32) -> (i32, i32, i32) {
    %c0_i32 = arith.constant 0 : i32
    %c0_i32_0 = arith.constant 0 : i32
    %c0_i32_1 = arith.constant 0 : i32
    return %arg0, %c0_i32, %c0_i32_0 : i32, i32, i32
  }
}

</mosaic_0001>

<bundles_post_ra>
// kernel: tpu_custom_call.1
= control target key start
LH: loop header
LB: loop body
LE: loop exit
PB: predicated region body
PF: predicated region fallthrough
CT: control target
= control target key end

     0   :  { %8 = vsyncpa [#allocation3], 0  ;;  %s4217_s0 = inlined_call_operand.vmem [shape: f32[2,16,16,4], index: 0, kind: input, shape index: {}]   ;;  %s4218_s1 = inlined_call_operand.vmem [shape: f32[36,128], index: 1, kind: input, shape index: {}]   ;;  %s4219_s2 = inlined_call_operand.vmem [shape: f32[1,128], index: 2, kind: input, shape index: {}]   ;;  %s4220_s3 = inlined_call_operand.hbm [shape: f32[2,256,128], index: 3, kind: output, shape index: {}]  }
   0x1   :  { %10 = vsyncpa [#allocation3 + $0x1], 0  ;;  %s2202_s12 = smov 0   ;;  %s2204_s13 = smov 0  }
   0x2   :  { %s2206_s14 = smov 0   ;;  %s2208_s15 = smov 0  }
   0x3 LB: > { %s2223_s16 = sadd.s32 4294967295, %s2170_s15   ;;  %s1971_s17 = sadd.s32 4294967294, %s2170_s15   ;;  %s2170_s15 = sphi %s2208_s15, %s4732_s15   ;;  %s2166_s14 = sphi %s2206_s14, %s4731_s14   ;;  %s2162_s13 = sphi %s2204_s13, %s4730_s13   ;;  %s2158_s12 = sphi %s2202_s12, %s4729_s12  }
   0x4   : > { %s2227_s18 = sadd.s32 1, %s2170_s15   ;;  %s91_s19 = sadd.s32 1, %s2166_s14 }
   0x5   : > { %s88_s20 = ssub.s32 %s2170_s15, %s2227_s18  ;;  %p101_p0 = scmp.ne.s32.totalorder %s2166_s14, %s2162_s13 }
   0x6   : > { %p89_p1 = scmp.eq.s32.totalorder %s88_s20, 0  ;;  %p102_p2 = scmp.eq.s32.totalorder %s2223_s16, 1 }
   0x7   : > { %p107_p3 = scmp.ne.s32.totalorder %s2162_s13, %s2158_s12  ;;  %p108_p4 = scmp.eq.s32.totalorder %s1971_s17, 1 }
   0x8   : > { %s2238_s21 = scalar_select %p89_p1, %s2166_s14, %s91_s19  }
   0x9   : > { %p2240_p5 = por %p102_p2, %p101_p0  ;;  %p2244_p6 = por %p108_p4, %p107_p3 }
   0xa   : > { %p1974_p7 = scmp.ge.s32.totalorder %s2170_s15, 1  ;;  %p140_p8 = scmp.lt.s32.totalorder %s2170_s15, 3 }
   0xc   : > { %p141_p9 = pnand %p1974_p7, %p140_p8 }
   0xe   : > { %144 = sbr.rel (%p141_p9) target bundleno = 947 (0x3b3), region = 32 }
  0x13   : > { %vm234_vm0 = vcmask 1040384   ;;  %p164_p10 = scmp.lt.s32.totalorder %s2223_s16, 1  ;;  %v2172_v0 = vmov 0.0   ;;  %vm400_vm1 = vcmask 1046528   ;;  %s2173_s29 = smov 4   ;;  %vm577_vm2 = vcmask 1045504  }
  0x14   : > { %v2251_v1 = vrot.slane %v2172_v0, 7  ;;  %s2174_s30 = smov 8   ;;  %s2175_s4 = smov 12   ;;  %vm1342_vm3 = vcmask 31744   ;;  %vm1375_vm4 = vcmask 64512   ;;  %vm1408_vm5 = vcmask 97280  }
  0x15   : > { %s165_s24 = scalar_select %p164_p10, %s2223_s16, 1  ;;  %vm1441_vm6 = vcmask 130048   ;;  %vm1474_vm7 = vcmask 162816   ;;  %vm1507_vm8 = vcmask 195584   ;;  %vm1712_vm9 = vcmask 1043456  }
  0x16   : > { %4350 = vst [vmem:[#allocation5_spill] sm:$0xff] %v2251_v1  ;;  %v2256_v2 = vsel %vm234_vm0, 0.0, %v2251_v1  ;;  %v2260_v3 = vsel %vm234_vm0, %v2251_v1, 0.0  ;;  %v402_v4 = vrot.slane %v2251_v1, 1  ;;  %s2176_s5 = smov 16   ;;  %s2177_s6 = smov 20  }
  0x17   : > { %4351 = vst [vmem:[#allocation6_spill] sm:$0xff] %v2256_v2  ;;  %v401_v5 = vrot.slane %v2256_v2, 1  ;;  %v404_v6 = vrot.slane %v2260_v3, 1  ;;  %s2016_s25 = sshll.u32 %s165_s24, 8  ;;  %s2178_s7 = smov 24   ;;  %vm1540_vm10 = vcmask 228352  }
  0x18   : > { %s2268_s28 = scalar_lea.vmem %s4217_s0, %s2016_s25  ;;  %s2179_s8 = smov 28   ;;  %vm1573_vm11 = vcmask 261120   ;;  %vm1615_vm12 = vcmask 293888  }
  0x19   : > { %v403_v7 = vsel %vm400_vm1, %v401_v5, %v402_v4  ;;  %v405_v8 = vsel %vm400_vm1, %v402_v4, %v404_v6  ;;  %v171_v9 = vld [vmem:[%s2268_s28 + $0x10] sm:$0xff]  ;;  %v172_v10 = vld [vmem:[%s2268_s28 + $0x18] sm:$0xff]  ;;  %v169_v11 = vld [vmem:[%s2268_s28] sm:$0xff]  ;;  %s2180_s9 = smov 32   ;;  %s2128_s27 = scalar_lea.hbm %s4220_s3, 512 }
  0x1a   : > { %v2275_v12 = vpack.i.bf16 %v405_v8, %v403_v7  ;;  %v240_v13 = vrot.slane %v171_v9, 7  ;;  %v241_v14 = vrot.slane %v172_v10, 7  ;;  %v170_v15 = vld [vmem:[%s2268_s28 + $0x8] sm:$0xff]  ;;  %v173_v16 = vld [vmem:[%s2268_s28 + $0x20] sm:$0xff]  ;;  %v237_v18 = vrot.slane %v169_v11, 7  ;;  %v175_v29 = vld [vmem:[%s2268_s28 + $0x30] sm:$0xff] }
  0x1b   : > { %v174_v17 = vld [vmem:[%s2268_s28 + $0x28] sm:$0xff]  ;;  %v238_v19 = vrot.slane %v170_v15, 7  ;;  %v243_v20 = vrot.slane %v173_v16, 7  ;;  %v176_v37 = vld [vmem:[%s2268_s28 + $0x38] sm:$0xff]  ;;  %v246_v39 = vrot.slane %v175_v29, 7  ;;  %v177_v46 = vld [vmem:[%s2268_s28 + $0x40] sm:$0xff] }
  0x1c   : > { %4352 = vst [vmem:[#allocation7_spill] sm:$0xff] %v2275_v12  ;;  %v244_v21 = vrot.slane %v174_v17, 7  ;;  %2083 = vrot.lane.b32.xlu0 %v2275_v12, %s2173_s29  ;;  %v2283_v22 = vsel %vm234_vm0, %v240_v13, %v241_v14  ;;  %v2286_v23 = vsel %vm234_vm0, %v241_v14, 0.0  ;;  %v2289_v24 = vsel %vm234_vm0, 0.0, %v240_v13  ;;  %v178_v47 = vld [vmem:[%s2268_s28 + $0x48] sm:$0xff]  ;;  %v179_v56 = vld [vmem:[%s2268_s28 + $0x50] sm:$0xff] }
  0x1d   : > { %4353 = vst [vmem:[#allocation8_spill] sm:$0xff] %v2283_v22  ;;  %v412_v25 = vrot.slane %v2283_v22, 1  ;;  %v414_v26 = vrot.slane %v2286_v23, 1  ;;  %v2294_v27 = vsel %vm234_vm0, %v237_v18, %v238_v19  ;;  %v2297_v28 = vsel %vm234_vm0, %v238_v19, 0.0  ;;  %v180_v57 = vld [vmem:[%s2268_s28 + $0x58] sm:$0xff]  ;;  %v181_v13 = vld [vmem:[%s2268_s28 + $0x60] sm:$0xff] }
  0x1e   : > { %4354 = vst [vmem:[#allocation9_spill] sm:$0xff] %v2289_v24  ;;  %v407_v30 = vrot.slane %v2294_v27, 1  ;;  %v409_v31 = vrot.slane %v2297_v28, 1  ;;  %v2303_v32 = vsel %vm234_vm0, 0.0, %v237_v18  ;;  %v2306_v33 = vsel %vm234_vm0, %v243_v20, %v244_v21  ;;  %v182_v14 = vld [vmem:[%s2268_s28 + $0x68] sm:$0xff] }
  0x1f   : > { %4355 = vst [vmem:[#allocation10_spill] sm:$0xff] %v2294_v27  ;;  %v2309_v34 = vsel %vm400_vm1, %v412_v25, %v414_v26  ;;  %v406_v35 = vrot.slane %v2303_v32, 1  ;;  %v2313_v36 = vsel %vm234_vm0, 0.0, %v243_v20  ;;  %v417_v42 = vrot.slane %v2306_v33, 1  ;;  %v184_v26 = vld [vmem:[%s2268_s28 + $0x78] sm:$0xff] }
  0x20   : > { %4356 = vst [vmem:[#allocation11_spill] sm:$0xff] %v2303_v32  ;;  %491 = vrot.lane.b32.xlu2 %v2309_v34, %s2173_s29  ;;  %v2319_v38 = vsel %vm400_vm1, %v407_v30, %v409_v31  ;;  %v416_v41 = vrot.slane %v2313_v36, 1  ;;  %v411_v43 = vrot.slane %v2289_v24, 1  ;;  %v2330_v44 = vsel %vm234_vm0, %v244_v21, 0.0 }
  0x21   : > { %4357 = vst [vmem:[#allocation12_spill] sm:$0xff] %v2306_v33  ;;  %487 = vrot.lane.b32.xlu1 %v2319_v38, %s2173_s29  ;;  %v2324_v40 = vsel %vm400_vm1, %v406_v35, %v407_v30  ;;  %v247_v45 = vrot.slane %v176_v37, 7  ;;  %v419_v50 = vrot.slane %v2330_v44, 1  ;;  %v2344_v51 = vsel %vm234_vm0, 0.0, %v246_v39 }
  0x22   : > { %4358 = vst [vmem:[#allocation13_spill] sm:$0xff] %v2309_v34  ;;  %v2337_v48 = vsel %vm400_vm1, %v416_v41, %v417_v42  ;;  %v2340_v49 = vsel %vm400_vm1, %v411_v43, %v412_v25  ;;  %v249_v54 = vrot.slane %v177_v46, 7  ;;  %v250_v55 = vrot.slane %v178_v47, 7  ;;  %v183_v25 = vld [vmem:[%s2268_s28 + $0x70] sm:$0xff] }
  0x23   : > { %4359 = vst [vmem:[#allocation14_spill] sm:$0xff] %v2337_v48  ;;  %v2347_v52 = vsel %vm234_vm0, %v246_v39, %v247_v45  ;;  %v2350_v53 = vsel %vm234_vm0, %v247_v45, 0.0  ;;  %v2359_v58 = vsel %vm400_vm1, %v417_v42, %v419_v50  ;;  %v421_v61 = vrot.slane %v2344_v51, 1  ;;  %v185_v42 = vld [vmem:[%s2268_s28 + $0x80] sm:$0xff]  ;;  %v186_v45 = vld [vmem:[%s2268_s28 + $0x88] sm:$0xff] }
  0x24   : > { %485 = vrot.lane.b32.xlu0 %v2324_v40, %s2173_s29  ;;  %4360 = vst [vmem:[#allocation15_spill] sm:$0xff] %v2344_v51  ;;  %v422_v59 = vrot.slane %v2347_v52, 1  ;;  %v424_v60 = vrot.slane %v2350_v53, 1  ;;  %v2365_v62 = vsel %vm234_vm0, %v249_v54, %v250_v55  ;;  %v2368_v63 = vsel %vm234_vm0, 0.0, %v249_v54 }
  0x25   : > { %4361 = vst [vmem:[#allocation16_spill] sm:$0xff] %v2347_v52  ;;  %v252_v0 = vrot.slane %v179_v56, 7  ;;  %v253_v4 = vrot.slane %v180_v57, 7  ;;  %v426_v6 = vrot.slane %v2368_v63, 1  ;;  %v427_v7 = vrot.slane %v2365_v62, 1 }
  0x26   : > { %4362 = vst [vmem:[#allocation17_spill] sm:$0xff] %v2359_v58  ;;  %v2373_v5 = vsel %vm400_vm1, %v422_v59, %v424_v60  ;;  %v2378_v8 = vsel %vm400_vm1, %v421_v61, %v422_v59  ;;  %v2387_v11 = vsel %vm234_vm0, %v250_v55, 0.0  ;;  %v255_v20 = vrot.slane %v181_v13, 7 }
  0x27   : > { %4363 = vst [vmem:[#allocation18_spill] sm:$0xff] %v2373_v5  ;;  %v2381_v9 = vsel %vm234_vm0, %v252_v0, %v253_v4  ;;  %v2384_v10 = vsel %vm234_vm0, 0.0, %v252_v0  ;;  %v2396_v15 = vsel %vm400_vm1, %v426_v6, %v427_v7  ;;  %v429_v18 = vrot.slane %v2387_v11, 1 }
  0x28   : > { %493 = vrot.lane.b32.xlu2 %v2337_v48, %s2173_s29  ;;  %4364 = vst [vmem:[#allocation19_spill] sm:$0xff] %v2378_v8  ;;  %v431_v16 = vrot.slane %v2384_v10, 1  ;;  %v432_v17 = vrot.slane %v2381_v9, 1  ;;  %v2402_v19 = vsel %vm234_vm0, %v253_v4, 0.0  ;;  %v256_v21 = vrot.slane %v182_v14, 7  ;;  %v187_v14 = vld [vmem:[%s2268_s28 + $0x90] sm:$0xff] }
  0x29   : > { %489 = vrot.lane.b32.xlu1 %v2340_v49, %s2173_s29  ;;  %4365 = vst [vmem:[#allocation20_spill] sm:$0xff] %v2396_v15  ;;  %v2412_v30 = vsel %vm400_vm1, %v427_v7, %v429_v18  ;;  %v434_v31 = vrot.slane %v2402_v19, 1  ;;  %v258_v39 = vrot.slane %v183_v25, 7  ;;  %v259_v41 = vrot.slane %v184_v26, 7 }
  0x2a   : > { %v2409_v29 = vsel %vm400_vm1, %v431_v16, %v432_v17  ;;  %4367 = vst [vmem:[#allocation22_spill] sm:$0xff] %v2412_v30  ;;  %v2416_v35 = vsel %vm234_vm0, %v255_v20, %v256_v21  ;;  %v2419_v37 = vsel %vm234_vm0, %v256_v21, 0.0  ;;  %v2423_v43 = vsel %vm234_vm0, 0.0, %v255_v20  ;;  %v188_v16 = vld [vmem:[%s2268_s28 + $0x98] sm:$0xff] }
  0x2b   : > { %4366 = vst [vmem:[#allocation21_spill] sm:$0xff] %v2409_v29  ;;  %v2431_v46 = vsel %vm400_vm1, %v432_v17, %v434_v31  ;;  %v437_v47 = vrot.slane %v2416_v35, 1  ;;  %v439_v50 = vrot.slane %v2419_v37, 1  ;;  %v261_v54 = vrot.slane %v185_v42, 7 }
  0x2c   : > { %495 = vrot.lane.b32.xlu0 %v2359_v58, %s2173_s29  ;;  %4368 = vst [vmem:[#allocation23_spill] sm:$0xff] %v2431_v46  ;;  %v436_v55 = vrot.slane %v2423_v43, 1  ;;  %v2437_v56 = vsel %vm234_vm0, %v258_v39, %v259_v41  ;;  %v2440_v57 = vsel %vm234_vm0, 0.0, %v258_v39  ;;  %v262_v59 = vrot.slane %v186_v45, 7  ;;  %v189_v39 = vld [vmem:[%s2268_s28 + $0xa0] sm:$0xff] }
  0x2d   : > { %v2445_v60 = vsel %vm400_vm1, %v437_v47, %v439_v50  ;;  %v441_v61 = vrot.slane %v2440_v57, 1  ;;  %v442_v0 = vrot.slane %v2437_v56, 1  ;;  %v2456_v7 = vsel %vm234_vm0, 0.0, %v261_v54 }
  0x2e   : > { %4369 = vst [vmem:[#allocation24_spill] sm:$0xff] %v2445_v60  ;;  %v2450_v4 = vsel %vm400_vm1, %v436_v55, %v437_v47  ;;  %v2453_v6 = vsel %vm234_vm0, %v261_v54, %v262_v59  ;;  %v2459_v13 = vsel %vm234_vm0, %v259_v41, 0.0  ;;  %v446_v18 = vrot.slane %v2456_v7, 1  ;;  %v190_v41 = vld [vmem:[%s2268_s28 + $0xa8] sm:$0xff] }
  0x2f   : > { %4370 = vst [vmem:[#allocation25_spill] sm:$0xff] %v2450_v4  ;;  %v2468_v17 = vsel %vm400_vm1, %v441_v61, %v442_v0  ;;  %v447_v20 = vrot.slane %v2453_v6, 1  ;;  %v2473_v21 = vsel %vm234_vm0, %v262_v59, 0.0  ;;  %v444_v25 = vrot.slane %v2459_v13, 1 }
  0x30   : > { %499 = vrot.lane.b32.xlu2 %v2373_v5, %s2173_s29  ;;  %4371 = vst [vmem:[#allocation26_spill] sm:$0xff] %v2468_v17  ;;  %v264_v26 = vrot.slane %v187_v14, 7  ;;  %v265_v31 = vrot.slane %v188_v16, 7  ;;  %v449_v42 = vrot.slane %v2473_v21, 1  ;;  %v267_v47 = vrot.slane %v189_v39, 7  ;;  %v191_v14 = vld [vmem:[%s2268_s28 + $0xb0] sm:$0xff] }
  0x31   : > { %497 = vrot.lane.b32.xlu1 %v2378_v8, %s2173_s29  ;;  %v2482_v45 = vsel %vm400_vm1, %v446_v18, %v447_v20  ;;  %v268_v50 = vrot.slane %v190_v41, 7  ;;  %v2485_v54 = vsel %vm400_vm1, %v442_v0, %v444_v25  ;;  %v192_v16 = vld [vmem:[%s2268_s28 + $0xb8] sm:$0xff]  ;;  %v270_v41 = vrot.slane %v191_v14, 7 }
  0x32   : > { %4372 = vst [vmem:[#allocation27_spill] sm:$0xff] %v2482_v45  ;;  %v2488_v55 = vsel %vm234_vm0, %v264_v26, %v265_v31  ;;  %v2491_v59 = vsel %vm234_vm0, %v265_v31, 0.0  ;;  %v2494_v61 = vsel %vm234_vm0, 0.0, %v264_v26  ;;  %v2501_v18 = vsel %vm400_vm1, %v447_v20, %v449_v42 }
  0x33   : > { %4373 = vst [vmem:[#allocation28_spill] sm:$0xff] %v2485_v54  ;;  %v452_v0 = vrot.slane %v2488_v55, 1  ;;  %v454_v25 = vrot.slane %v2491_v59, 1  ;;  %v2508_v31 = vsel %vm234_vm0, %v267_v47, %v268_v50  ;;  %v2511_v26 = vsel %vm234_vm0, 0.0, %v267_v47 }
  0x34   : > { %501 = vrot.lane.b32.xlu0 %v2396_v15, %s2173_s29  ;;  %4374 = vst [vmem:[#allocation29_spill] sm:$0xff] %v2501_v18  ;;  %v451_v39 = vrot.slane %v2494_v61, 1  ;;  %v271_v20 = vrot.slane %v192_v16, 7  ;;  %v581_v42 = vrot.slane %v2260_v3, 2  ;;  %v456_v12 = vrot.slane %v2511_v26, 1 }
  0x35   : > { %4375 = vst [vmem:[#allocation30_spill] sm:$0xff] %v2508_v31  ;;  %v2523_v47 = vsel %vm234_vm0, %v268_v50, 0.0  ;;  %v579_v14 = vrot.slane %v2251_v1, 2 }
  0x36   : > { %4376 = vst [vmem:[#allocation31_spill] sm:$0xff] %v2511_v26  ;;  %v2528_v3 = vsel %vm400_vm1, %v451_v39, %v452_v0  ;;  %v2531_v16 = vsel %vm234_vm0, %v270_v41, %v271_v20  ;;  %v459_v39 = vrot.slane %v2523_v47, 1 }
  0x37   : > { %4378 = vst [vmem:[#allocation33_spill] sm:$0xff] %v2528_v3 }
  0x38   : > { %505 = vrot.lane.b32.xlu2 %v2409_v29, %s2173_s29  ;;  %4379 = vst [vmem:[#allocation34_spill] sm:$0xff] %v2531_v16  ;;  %v198_v29 = vld [vmem:[%s2268_s28 + $0xe8] sm:$0xff] }
  0x39   : > { %503 = vrot.lane.b32.xlu1 %v2412_v30, %s2173_s29 }
  0x3c   : > { %507 = vrot.lane.b32.xlu0 %v2431_v46, %s2173_s29 }
  0x40   : > { %511 = vrot.lane.b32.xlu2 %v2445_v60, %s2173_s29  ;;  %v582_v60 = vsel %vm577_vm2, %v579_v14, %v581_v42 }
  0x41   : > { %509 = vrot.lane.b32.xlu1 %v2450_v4, %s2173_s29  ;;  %v194_v4 = vld [vmem:[%s2268_s28 + $0xc8] sm:$0xff] }
  0x44   : > { %513 = vrot.lane.b32.xlu0 %v2468_v17, %s2173_s29  ;;  %v578_v17 = vrot.slane %v2256_v2, 2  ;;  %v2553_v2 = vsel %vm234_vm0, %v271_v20, 0.0 }
  0x46   : > { %v580_v50 = vsel %vm577_vm2, %v578_v17, %v579_v14  ;;  %v462_v17 = vrot.slane %v2531_v16, 1  ;;  %v274_v14 = vrot.slane %v194_v4, 7 }
  0x47   : > { %v2546_v1 = vpack.i.bf16 %v582_v60, %v580_v50 }
  0x48   : > { %517 = vrot.lane.b32.xlu2 %v2482_v45, %s2173_s29  ;;  %v2520_v45 = vsel %vm400_vm1, %v452_v0, %v454_v25  ;;  %v193_v25 = vld [vmem:[%s2268_s28 + $0xc0] sm:$0xff]  ;;  %v2570_v4 = vsel %vm234_vm0, %v274_v14, 0.0 }
  0x49   : > { %515 = vrot.lane.b32.xlu1 %v2485_v54, %s2173_s29  ;;  %v457_v54 = vrot.slane %v2508_v31, 1  ;;  %4377 = vst [vmem:[#allocation32_spill] sm:$0xff] %v2520_v45  ;;  %v273_v42 = vrot.slane %v193_v25, 7 }
  0x4a   : > { %4382 = vst [vmem:[#allocation37_spill] sm:$0xff] %v2546_v1 }
  0x4b   : > { %v2543_v0 = vsel %vm400_vm1, %v456_v12, %v457_v54  ;;  %v195_v12 = vld [vmem:[%s2268_s28 + $0xd0] sm:$0xff]  ;;  %v2563_v50 = vsel %vm400_vm1, %v457_v54, %v459_v39  ;;  %v2567_v46 = vsel %vm234_vm0, %v273_v42, %v274_v14  ;;  %v2573_v20 = vsel %vm234_vm0, 0.0, %v273_v42 }
  0x4c   : > { %519 = vrot.lane.b32.xlu0 %v2501_v18, %s2173_s29  ;;  %v2534_v18 = vsel %vm234_vm0, 0.0, %v270_v41  ;;  %4381 = vst [vmem:[#allocation36_spill] sm:$0xff] %v2543_v0  ;;  %v276_v25 = vrot.slane %v195_v12, 7  ;;  %v467_v39 = vrot.slane %v2567_v46, 1  ;;  %v466_v42 = vrot.slane %v2573_v20, 1 }
  0x4d   : > { %4380 = vst [vmem:[#allocation35_spill] sm:$0xff] %v2534_v18  ;;  %v461_v41 = vrot.slane %v2534_v18, 1 }
  0x4e   : > { %4384 = vst [vmem:[#allocation39_spill] sm:$0xff] %v2563_v50  ;;  %v2601_v15 = vsel %vm400_vm1, %v466_v42, %v467_v39 }
  0x4f   : > { %v2560_v60 = vsel %vm400_vm1, %v461_v41, %v462_v17  ;;  %4385 = vst [vmem:[#allocation40_spill] sm:$0xff] %v2567_v46  ;;  %v469_v41 = vrot.slane %v2570_v4, 1 }
  0x50   : > { %523 = vrot.lane.b32.xlu2 %v2520_v45, %s2173_s29  ;;  %v196_v45 = vld [vmem:[%s2268_s28 + $0xd8] sm:$0xff]  ;;  %4383 = vst [vmem:[#allocation38_spill] sm:$0xff] %v2560_v60 }
  0x51   : > { %521 = vrot.lane.b32.xlu1 %v2528_v3, %s2173_s29  ;;  %v464_v3 = vrot.slane %v2553_v2, 1  ;;  %4386 = vst [vmem:[#allocation41_spill] sm:$0xff] %v2573_v20  ;;  %v277_v30 = vrot.slane %v196_v45, 7  ;;  %v2591_v45 = vsel %vm234_vm0, 0.0, %v276_v25 }
  0x52   : > { %4390 = vst [vmem:[#allocation45_spill] sm:$0xff] %v2601_v15 }
  0x53   : > { %v2582_v54 = vsel %vm400_vm1, %v462_v17, %v464_v3  ;;  %v2588_v14 = vsel %vm234_vm0, %v276_v25, %v277_v30  ;;  %v2596_v3 = vsel %vm400_vm1, %v467_v39, %v469_v41  ;;  %v471_v17 = vrot.slane %v2591_v45, 1 }
  0x54   : > { %525 = vrot.lane.b32.xlu0 %v2543_v0, %s2173_s29  ;;  %v197_v0 = vld [vmem:[%s2268_s28 + $0xe0] sm:$0xff]  ;;  %4387 = vst [vmem:[#allocation42_spill] sm:$0xff] %v2582_v54 }
  0x55   : > { %4388 = vst [vmem:[#allocation43_spill] sm:$0xff] %v2588_v14  ;;  %v279_v12 = vrot.slane %v197_v0, 7 }
  0x56   : > { %4389 = vst [vmem:[#allocation44_spill] sm:$0xff] %v2596_v3 }
  0x57   : > { %v2607_v25 = vsel %vm234_vm0, 0.0, %v279_v12 }
  0x58   : > { %529 = vrot.lane.b32.xlu2 %v2560_v60, %s2173_s29  ;;  %v280_v60 = vrot.slane %v198_v29, 7  ;;  %4392 = vst [vmem:[#allocation47_spill] sm:$0xff] %v2607_v25  ;;  %v2610_v29 = vsel %vm234_vm0, %v277_v30, 0.0  ;;  %v476_v39 = vrot.slane %v2607_v25, 1 }
  0x59   : > { %527 = vrot.lane.b32.xlu1 %v2563_v50, %s2173_s29  ;;  %v472_v50 = vrot.slane %v2588_v14, 1  ;;  %v474_v42 = vrot.slane %v2610_v29, 1 }
  0x5a   : > { %v2604_v8 = vsel %vm234_vm0, %v279_v12, %v280_v60  ;;  %v2623_v12 = vsel %vm234_vm0, %v280_v60, 0.0 }
  0x5b   : > { %4391 = vst [vmem:[#allocation46_spill] sm:$0xff] %v2604_v8  ;;  %v2617_v0 = vsel %vm400_vm1, %v471_v17, %v472_v50  ;;  %v477_v41 = vrot.slane %v2604_v8, 1  ;;  %v2632_v17 = vsel %vm400_vm1, %v472_v50, %v474_v42  ;;  %v586_v50 = vrot.slane %v2297_v28, 2 }
  0x5c   : > { %531 = vrot.lane.b32.xlu0 %v2582_v54, %s2173_s29  ;;  %4393 = vst [vmem:[#allocation48_spill] sm:$0xff] %v2617_v0  ;;  %v591_v42 = vrot.slane %v2286_v23, 2 }
  0x5d   : > { %v2628_v30 = vsel %vm400_vm1, %v476_v39, %v477_v41  ;;  %4395 = vst [vmem:[#allocation50_spill] sm:$0xff] %v2632_v17 }
  0x5e   : > { %4394 = vst [vmem:[#allocation49_spill] sm:$0xff] %v2628_v30 }
  0x60   : > { %535 = vrot.lane.b32.xlu2 %v2596_v3, %s2173_s29  ;;  %v583_v3 = vrot.slane %v2303_v32, 2 }
  0x61   : > { %533 = vrot.lane.b32.xlu1 %v2601_v15, %s2173_s29  ;;  %v479_v15 = vrot.slane %v2623_v12, 1 }
  0x63   : > { %v2639_v60 = vsel %vm400_vm1, %v477_v41, %v479_v15  ;;  %v589_v41 = vrot.slane %v2283_v22, 2 }
  0x64   : > { %537 = vrot.lane.b32.xlu0 %v2617_v0, %s2173_s29  ;;  %4396 = vst [vmem:[#allocation51_spill] sm:$0xff] %v2639_v60  ;;  %v584_v0 = vrot.slane %v2294_v27, 2 }
  0x65   : > { %v2662_v28 = vsel %vm577_vm2, %v589_v41, %v591_v42 }
  0x66   : > { %v2646_v39 = vsel %vm577_vm2, %v583_v3, %v584_v0  ;;  %v2654_v15 = vsel %vm577_vm2, %v584_v0, %v586_v50  ;;  %4399 = vst [vmem:[#allocation54_spill] sm:$0xff] %v2662_v28  ;;  %v593_v3 = vrot.slane %v2313_v36, 2  ;;  %v598_v0 = vrot.slane %v2344_v51, 2 }
  0x67   : > { %4397 = vst [vmem:[#allocation52_spill] sm:$0xff] %v2646_v39  ;;  %v599_v50 = vrot.slane %v2347_v52, 2 }
  0x68   : > { %541 = vrot.lane.b32.xlu2 %v2628_v30, %s2173_s29  ;;  %4398 = vst [vmem:[#allocation53_spill] sm:$0xff] %v2654_v15 }
  0x69   : > { %539 = vrot.lane.b32.xlu1 %v2632_v17, %s2173_s29 }
  0x6c   : > { %543 = vrot.lane.b32.xlu0 %v2639_v60, %s2173_s29  ;;  %v588_v60 = vrot.slane %v2289_v24, 2  ;;  %s161_s29 = sand.u32 1, %s2162_s13  }
  0x70   : > { %662 = vrot.lane.b32.xlu2 %v2646_v39, %s2174_s30  ;;  %v594_v39 = vrot.slane %v2306_v33, 2 }
  0x71   : > { %2088 = vrot.lane.b32.xlu1 %v2546_v1, %s2174_s30  ;;  %v2667_v1 = vsel %vm577_vm2, %v588_v60, %v589_v41  ;;  %v2684_v60 = vsel %vm577_vm2, %v598_v0, %v599_v50  ;;  %v601_v41 = vrot.slane %v2350_v53, 2  ;;  %v603_v53 = vrot.slane %v2368_v63, 2 }
  0x72   : > { %v2674_v23 = vsel %vm577_vm2, %v593_v3, %v594_v39  ;;  %4402 = vst [vmem:[#allocation57_spill] sm:$0xff] %v2684_v60 }
  0x73   : > { %4400 = vst [vmem:[#allocation55_spill] sm:$0xff] %v2674_v23  ;;  %v2695_v3 = vsel %vm577_vm2, %v599_v50, %v601_v41  ;;  %v613_v41 = vrot.slane %v2423_v43, 2 }
  0x74   : > { %664 = vrot.lane.b32.xlu0 %v2654_v15, %s2174_s30  ;;  %v596_v15 = vrot.slane %v2330_v44, 2  ;;  %4404 = vst [vmem:[#allocation59_spill] sm:$0xff] %v2695_v3  ;;  %v604_v44 = vrot.slane %v2365_v62, 2 }
  0x76   : > { %v2710_v50 = vsel %vm577_vm2, %v603_v53, %v604_v44  ;;  %v616_v53 = vrot.slane %v2419_v37, 2  ;;  %v618_v37 = vrot.slane %v2440_v57, 2 }
  0x77   : > { %4407 = vst [vmem:[#allocation62_spill] sm:$0xff] %v2710_v50 }
  0x78   : > { %668 = vrot.lane.b32.xlu2 %v2662_v28, %s2174_s30  ;;  %v2688_v28 = vsel %vm577_vm2, %v594_v39, %v596_v15  ;;  %v608_v15 = vrot.slane %v2384_v10, 2 }
  0x79   : > { %666 = vrot.lane.b32.xlu1 %v2667_v1, %s2174_s30  ;;  %4403 = vst [vmem:[#allocation58_spill] sm:$0xff] %v2688_v28 }
  0x7a   : > { %v2678_v42 = vpop.permute.xlu2 %491 }
  0x7b   : > { %4401 = vst [vmem:[#allocation56_spill] sm:$0xff] %v2678_v42  ;;  %v606_v42 = vrot.slane %v2387_v11, 2 }
  0x7c   : > { %670 = vrot.lane.b32.xlu0 %v2674_v23, %s2174_s30 }
  0x7d   : > { %v2705_v39 = vsel %vm577_vm2, %v604_v44, %v606_v42  ;;  %v614_v42 = vrot.slane %v2416_v35, 2 }
  0x7e   : > { %4406 = vst [vmem:[#allocation61_spill] sm:$0xff] %v2705_v39 }
  0x7f   : > { %v2727_v44 = vsel %vm577_vm2, %v613_v41, %v614_v42  ;;  %v621_v41 = vrot.slane %v2459_v13, 2 }
  0x80   : > { %674 = vrot.lane.b32.xlu2 %v2684_v60, %s2174_s30  ;;  %v609_v60 = vrot.slane %v2381_v9, 2  ;;  %4410 = vst [vmem:[#allocation65_spill] sm:$0xff] %v2727_v44 }
  0x81   : > { %672 = vrot.lane.b32.xlu1 %v2688_v28, %s2174_s30 }
  0x82   : > { %v2699_v0 = vpop.permute.xlu2 %493  ;;  %v2717_v11 = vsel %vm577_vm2, %v608_v15, %v609_v60 }
  0x83   : > { %4405 = vst [vmem:[#allocation60_spill] sm:$0xff] %v2699_v0 }
  0x84   : > { %676 = vrot.lane.b32.xlu0 %v2695_v3, %s2174_s30  ;;  %4408 = vst [vmem:[#allocation63_spill] sm:$0xff] %v2717_v11  ;;  %v611_v3 = vrot.slane %v2402_v19, 2  ;;  %v2740_v19 = vsel %vm577_vm2, %v614_v42, %v616_v53  ;;  %v624_v42 = vrot.slane %v2453_v6, 2 }
  0x85   : > { %4413 = vst [vmem:[#allocation68_spill] sm:$0xff] %v2740_v19 }
  0x86   : > { %v2733_v15 = vsel %vm577_vm2, %v609_v60, %v611_v3  ;;  %v623_v3 = vrot.slane %v2456_v7, 2 }
  0x87   : > { %4412 = vst [vmem:[#allocation67_spill] sm:$0xff] %v2733_v15 }
  0x88   : > { %680 = vrot.lane.b32.xlu2 %v2705_v39, %s2174_s30 }
  0x89   : > { %678 = vrot.lane.b32.xlu1 %v2710_v50, %s2174_s30 }
  0x8a   : > { %v2721_v0 = vpop.permute.xlu2 %499 }
  0x8b   : > { %4409 = vst [vmem:[#allocation64_spill] sm:$0xff] %v2721_v0  ;;  %v619_v0 = vrot.slane %v2437_v56, 2 }
  0x8c   : > { %682 = vrot.lane.b32.xlu0 %v2717_v11, %s2174_s30 }
  0x8d   : > { %v2752_v60 = vsel %vm577_vm2, %v619_v0, %v621_v41  ;;  %v2759_v13 = vsel %vm577_vm2, %v618_v37, %v619_v0  ;;  %v628_v41 = vrot.slane %v2494_v61, 2  ;;  %v631_v37 = vrot.slane %v2491_v59, 2 }
  0x8e   : > { %v2730_v39 = vpop.permute.xlu0 %2083  ;;  %4416 = vst [vmem:[#allocation71_spill] sm:$0xff] %v2752_v60  ;;  %v633_v59 = vrot.slane %v2511_v26, 2 }
  0x8f   : > { %4411 = vst [vmem:[#allocation66_spill] sm:$0xff] %v2730_v39 }
  0x90   : > { %686 = vrot.lane.b32.xlu2 %v2727_v44, %s2174_s30  ;;  %4418 = vst [vmem:[#allocation73_spill] sm:$0xff] %v2759_v13 }
  0x91   : > { %684 = vrot.lane.b32.xlu1 %v2733_v15, %s2174_s30 }
  0x92   : > { %v2744_v11 = vpop.permute.xlu2 %505 }
  0x93   : > { %4414 = vst [vmem:[#allocation69_spill] sm:$0xff] %v2744_v11  ;;  %v2747_v39 = vpop.permute.xlu1 %487  ;;  %v629_v11 = vrot.slane %v2488_v55, 2 }
  0x94   : > { %4415 = vst [vmem:[#allocation70_spill] sm:$0xff] %v2747_v39  ;;  %688 = vrot.lane.b32.xlu0 %v2740_v19, %s2174_s30  ;;  %v2766_v39 = vsel %vm577_vm2, %v623_v3, %v624_v42 }
  0x95   : > { %4419 = vst [vmem:[#allocation74_spill] sm:$0xff] %v2766_v39  ;;  %v2778_v0 = vsel %vm577_vm2, %v628_v41, %v629_v11  ;;  %v636_v41 = vrot.slane %v2523_v47, 2 }
  0x96   : > { %v2756_v53 = vpop.permute.xlu0 %485  ;;  %4422 = vst [vmem:[#allocation77_spill] sm:$0xff] %v2778_v0 }
  0x97   : > { %4417 = vst [vmem:[#allocation72_spill] sm:$0xff] %v2756_v53  ;;  %v626_v53 = vrot.slane %v2473_v21, 2  ;;  %v2791_v21 = vsel %vm577_vm2, %v629_v11, %v631_v37  ;;  %v639_v11 = vrot.slane %v2531_v16, 2 }
  0x98   : > { %692 = vrot.lane.b32.xlu2 %v2752_v60, %s2174_s30  ;;  %4425 = vst [vmem:[#allocation80_spill] sm:$0xff] %v2791_v21 }
  0x99   : > { %690 = vrot.lane.b32.xlu1 %v2759_v13, %s2174_s30  ;;  %v2784_v60 = vsel %vm577_vm2, %v624_v42, %v626_v53  ;;  %v638_v53 = vrot.slane %v2534_v18, 2 }
  0x9a   : > { %v2770_v19 = vpop.permute.xlu2 %511  ;;  %4424 = vst [vmem:[#allocation79_spill] sm:$0xff] %v2784_v60 }
  0x9b   : > { %4420 = vst [vmem:[#allocation75_spill] sm:$0xff] %v2770_v19  ;;  %v2773_v44 = vpop.permute.xlu1 %489 }
  0x9c   : > { %4421 = vst [vmem:[#allocation76_spill] sm:$0xff] %v2773_v44  ;;  %694 = vrot.lane.b32.xlu0 %v2766_v39, %s2174_s30  ;;  %v634_v44 = vrot.slane %v2508_v31, 2 }
  0x9e   : > { %v2781_v3 = vpop.permute.xlu0 %495  ;;  %v2803_v42 = vsel %vm577_vm2, %v634_v44, %v636_v41  ;;  %v2810_v47 = vsel %vm577_vm2, %v633_v59, %v634_v44  ;;  %v643_v41 = vrot.slane %v2573_v20, 2  ;;  %v646_v59 = vrot.slane %v2570_v4, 2 }
  0x9f   : > { %4423 = vst [vmem:[#allocation78_spill] sm:$0xff] %v2781_v3  ;;  %v648_v4 = vrot.slane %v2591_v45, 2 }
  0xa0   : > { %698 = vrot.lane.b32.xlu2 %v2778_v0, %s2174_s30  ;;  %4428 = vst [vmem:[#allocation83_spill] sm:$0xff] %v2803_v42 }
  0xa1   : > { %696 = vrot.lane.b32.xlu1 %v2784_v60, %s2174_s30  ;;  %4430 = vst [vmem:[#allocation85_spill] sm:$0xff] %v2810_v47 }
  0xa2   : > { %v2795_v19 = vpop.permute.xlu2 %517 }
  0xa3   : > { %4426 = vst [vmem:[#allocation81_spill] sm:$0xff] %v2795_v19  ;;  %v2798_v3 = vpop.permute.xlu1 %497  ;;  %v644_v19 = vrot.slane %v2567_v46, 2 }
  0xa4   : > { %4427 = vst [vmem:[#allocation82_spill] sm:$0xff] %v2798_v3  ;;  %700 = vrot.lane.b32.xlu0 %v2791_v21, %s2174_s30  ;;  %v2817_v3 = vsel %vm577_vm2, %v638_v53, %v639_v11 }
  0xa5   : > { %4431 = vst [vmem:[#allocation86_spill] sm:$0xff] %v2817_v3  ;;  %v2829_v44 = vsel %vm577_vm2, %v643_v41, %v644_v19  ;;  %v651_v41 = vrot.slane %v2610_v29, 2 }
  0xa6   : > { %v2807_v37 = vpop.permute.xlu0 %501  ;;  %4434 = vst [vmem:[#allocation89_spill] sm:$0xff] %v2829_v44 }
  0xa7   : > { %4429 = vst [vmem:[#allocation84_spill] sm:$0xff] %v2807_v37  ;;  %v641_v37 = vrot.slane %v2553_v2, 2  ;;  %v2842_v2 = vsel %vm577_vm2, %v644_v19, %v646_v59  ;;  %v654_v19 = vrot.slane %v2604_v8, 2 }
  0xa8   : > { %704 = vrot.lane.b32.xlu2 %v2803_v42, %s2174_s30  ;;  %4437 = vst [vmem:[#allocation92_spill] sm:$0xff] %v2842_v2 }
  0xa9   : > { %702 = vrot.lane.b32.xlu1 %v2810_v47, %s2174_s30  ;;  %v2835_v42 = vsel %vm577_vm2, %v639_v11, %v641_v37  ;;  %v653_v37 = vrot.slane %v2607_v25, 2 }
  0xaa   : > { %v2821_v21 = vpop.permute.xlu2 %523  ;;  %4436 = vst [vmem:[#allocation91_spill] sm:$0xff] %v2835_v42 }
  0xab   : > { %4432 = vst [vmem:[#allocation87_spill] sm:$0xff] %v2821_v21  ;;  %v2824_v0 = vpop.permute.xlu1 %503  ;;  %v649_v21 = vrot.slane %v2588_v14, 2 }
  0xac   : > { %4433 = vst [vmem:[#allocation88_spill] sm:$0xff] %v2824_v0  ;;  %706 = vrot.lane.b32.xlu0 %v2817_v3, %s2174_s30 }
  0xad   : > { %v2854_v11 = vsel %vm577_vm2, %v649_v21, %v651_v41  ;;  %v2861_v29 = vsel %vm577_vm2, %v648_v4, %v649_v21 }
  0xae   : > { %v2832_v53 = vpop.permute.xlu0 %507  ;;  %4440 = vst [vmem:[#allocation95_spill] sm:$0xff] %v2854_v11 }
  0xaf   : > { %4435 = vst [vmem:[#allocation90_spill] sm:$0xff] %v2832_v53 }
  0xb0   : > { %710 = vrot.lane.b32.xlu2 %v2829_v44, %s2174_s30 }
  0xb1   : > { %708 = vrot.lane.b32.xlu1 %v2835_v42, %s2174_s30 }
  0xb2   : > { %v2846_v0 = vpop.permute.xlu2 %529 }
  0xb3   : > { %4438 = vst [vmem:[#allocation93_spill] sm:$0xff] %v2846_v0  ;;  %v2849_v53 = vpop.permute.xlu1 %509  ;;  %v2868_v0 = vsel %vm577_vm2, %v653_v37, %v654_v19 }
  0xb4   : > { %4439 = vst [vmem:[#allocation94_spill] sm:$0xff] %v2849_v53  ;;  %712 = vrot.lane.b32.xlu0 %v2842_v2, %s2174_s30  ;;  %v656_v53 = vrot.slane %v2623_v12, 2 }
  0xb5   : > { %4442 = vst [vmem:[#allocation97_spill] sm:$0xff] %v2868_v0 }
  0xb6   : > { %v2858_v59 = vpop.permute.xlu0 %513  ;;  %v2880_v4 = vsel %vm577_vm2, %v654_v19, %v656_v53 }
  0xb7   : > { %4441 = vst [vmem:[#allocation96_spill] sm:$0xff] %v2858_v59 }
  0xb8   : > { %716 = vrot.lane.b32.xlu2 %v2854_v11, %s2174_s30  ;;  %4445 = vst [vmem:[#allocation100_spill] sm:$0xff] %v2880_v4 }
  0xb9   : > { %714 = vrot.lane.b32.xlu1 %v2861_v29, %s2174_s30 }
  0xba   : > { %v2870_v41 = vpop.permute.xlu2 %535 }
  0xbb   : > { %4443 = vst [vmem:[#allocation98_spill] sm:$0xff] %v2870_v41  ;;  %v2873_v2 = vpop.permute.xlu1 %515 }
  0xbc   : > { %718 = vrot.lane.b32.xlu0 %v2868_v0, %s2174_s30 }
  0xbe   : > { %v2877_v21 = vpop.permute.xlu0 %519 }
  0xbf   : > { %4444 = vst [vmem:[#allocation99_spill] sm:$0xff] %v2877_v21 }
  0xc0   : > { %755 = vrot.lane.b32.xlu2 %v2303_v32, %s2175_s4 }
  0xc1   : > { %720 = vrot.lane.b32.xlu1 %v2880_v4, %s2174_s30 }
  0xc2   : > { %v2886_v37 = vpop.permute.xlu2 %541 }
  0xc3   : > { %4446 = vst [vmem:[#allocation101_spill] sm:$0xff] %v2886_v37  ;;  %v2888_v12 = vpop.permute.xlu1 %521 }
  0xc4   : > { %757 = vrot.lane.b32.xlu0 %v2294_v27, %s2175_s4 }
  0xc6   : > { %v2892_v41 = vpop.permute.xlu0 %525 }
  0xc7   : > { %4447 = vst [vmem:[#allocation102_spill] sm:$0xff] %v2892_v41 }
  0xc8   : > { %761 = vrot.lane.b32.xlu2 %v2283_v22, %s2175_s4 }
  0xc9   : > { %759 = vrot.lane.b32.xlu1 %v2289_v24, %s2175_s4 }
  0xca   : > { %v2898_v53 = vpop.permute.xlu2 %662 }
  0xcb   : > { %4448 = vst [vmem:[#allocation103_spill] sm:$0xff] %v2898_v53  ;;  %v2900_v19 = vpop.permute.xlu1 %527 }
  0xcc   : > { %4449 = vst [vmem:[#allocation104_spill] sm:$0xff] %v2900_v19  ;;  %763 = vrot.lane.b32.xlu0 %v2313_v36, %s2175_s4  ;;  %v199_v19 = vld [vmem:[%s2268_s28 + $0xf0] sm:$0xff] }
  0xce   : > { %v2904_v32 = vpop.permute.xlu0 %531 }
  0xcf   : > { %4450 = vst [vmem:[#allocation105_spill] sm:$0xff] %v2904_v32 }
  0xd0   : > { %767 = vrot.lane.b32.xlu2 %v2344_v51, %s2175_s4 }
  0xd1   : > { %765 = vrot.lane.b32.xlu1 %v2306_v33, %s2175_s4 }
  0xd2   : > { %v2910_v37 = vpop.permute.xlu2 %668 }
  0xd3   : > { %4451 = vst [vmem:[#allocation106_spill] sm:$0xff] %v2910_v37  ;;  %v2912_v27 = vpop.permute.xlu1 %533 }
  0xd4   : > { %4452 = vst [vmem:[#allocation107_spill] sm:$0xff] %v2912_v27  ;;  %769 = vrot.lane.b32.xlu0 %v2347_v52, %s2175_s4 }
  0xd6   : > { %v2916_v53 = vpop.permute.xlu0 %537 }
  0xd7   : > { %4453 = vst [vmem:[#allocation108_spill] sm:$0xff] %v2916_v53 }
  0xd8   : > { %773 = vrot.lane.b32.xlu2 %v2365_v62, %s2175_s4 }
  0xd9   : > { %771 = vrot.lane.b32.xlu1 %v2368_v63, %s2175_s4 }
  0xda   : > { %v2922_v32 = vpop.permute.xlu2 %674 }
  0xdb   : > { %4454 = vst [vmem:[#allocation109_spill] sm:$0xff] %v2922_v32  ;;  %v2924_v41 = vpop.permute.xlu1 %539 }
  0xdc   : > { %4455 = vst [vmem:[#allocation110_spill] sm:$0xff] %v2924_v41  ;;  %775 = vrot.lane.b32.xlu0 %v2384_v10, %s2175_s4 }
  0xde   : > { %v2928_v37 = vpop.permute.xlu0 %543 }
  0xdf   : > { %4456 = vst [vmem:[#allocation111_spill] sm:$0xff] %v2928_v37 }
  0xe0   : > { %779 = vrot.lane.b32.xlu2 %v2423_v43, %s2175_s4 }
  0xe1   : > { %777 = vrot.lane.b32.xlu1 %v2381_v9, %s2175_s4 }
  0xe2   : > { %v2934_v53 = vpop.permute.xlu2 %680 }
  0xe3   : > { %v2936_v21 = vpop.permute.xlu1 %2088 }
  0xe4   : > { %4457 = vst [vmem:[#allocation112_spill] sm:$0xff] %v2936_v21  ;;  %781 = vrot.lane.b32.xlu0 %v2416_v35, %s2175_s4 }
  0xe6   : > { %v2940_v32 = vpop.permute.xlu0 %664 }
  0xe7   : > { %4458 = vst [vmem:[#allocation113_spill] sm:$0xff] %v2940_v32 }
  0xe8   : > { %785 = vrot.lane.b32.xlu2 %v2437_v56, %s2175_s4 }
  0xe9   : > { %783 = vrot.lane.b32.xlu1 %v2440_v57, %s2175_s4 }
  0xea   : > { %v2946_v37 = vpop.permute.xlu2 %686 }
  0xeb   : > { %v2948_v41 = vpop.permute.xlu1 %666 }
  0xec   : > { %4459 = vst [vmem:[#allocation114_spill] sm:$0xff] %v2948_v41  ;;  %787 = vrot.lane.b32.xlu0 %v2456_v7, %s2175_s4 }
  0xee   : > { %v2952_v59 = vpop.permute.xlu0 %670 }
  0xef   : > { %4460 = vst [vmem:[#allocation115_spill] sm:$0xff] %v2952_v59 }
  0xf0   : > { %791 = vrot.lane.b32.xlu2 %v2494_v61, %s2175_s4 }
  0xf1   : > { %789 = vrot.lane.b32.xlu1 %v2453_v6, %s2175_s4 }
  0xf2   : > { %v2958_v32 = vpop.permute.xlu2 %692 }
  0xf3   : > { %v2960_v21 = vpop.permute.xlu1 %672 }
  0xf4   : > { %4461 = vst [vmem:[#allocation116_spill] sm:$0xff] %v2960_v21  ;;  %793 = vrot.lane.b32.xlu0 %v2488_v55, %s2175_s4 }
  0xf6   : > { %v2964_v41 = vpop.permute.xlu0 %676 }
  0xf7   : > { %4462 = vst [vmem:[#allocation117_spill] sm:$0xff] %v2964_v41 }
  0xf8   : > { %797 = vrot.lane.b32.xlu2 %v2508_v31, %s2175_s4 }
  0xf9   : > { %795 = vrot.lane.b32.xlu1 %v2511_v26, %s2175_s4 }
  0xfa   : > { %v2970_v59 = vpop.permute.xlu2 %698 }
  0xfb   : > { %v2972_v27 = vpop.permute.xlu1 %678 }
  0xfc   : > { %799 = vrot.lane.b32.xlu0 %v2534_v18, %s2175_s4  ;;  %v282_v18 = vrot.slane %v199_v19, 7 }
  0xfe   : > { %v2976_v21 = vpop.permute.xlu0 %682 }
 0x100   : > { %803 = vrot.lane.b32.xlu2 %v2573_v20, %s2175_s4 }
 0x101   : > { %801 = vrot.lane.b32.xlu1 %v2531_v16, %s2175_s4  ;;  %v2998_v16 = vld [vmem:[%s2268_s28 + $0xf8] sm:$0xff] }
 0x102   : > { %v2982_v41 = vpop.permute.xlu2 %704 }
 0x103   : > { %4463 = vst [vmem:[#allocation118_spill] sm:$0xff] %v2982_v41  ;;  %v2984_v31 = vpop.permute.xlu1 %684 }
 0x104   : > { %4464 = vst [vmem:[#allocation119_spill] sm:$0xff] %v2984_v31  ;;  %805 = vrot.lane.b32.xlu0 %v2567_v46, %s2175_s4  ;;  %v3005_v46 = vsel %vm234_vm0, 0.0, %v282_v18 }
 0x105   : > { %4468 = vst [vmem:[#allocation123_spill] sm:$0xff] %v3005_v46 }
 0x106   : > { %v2988_v26 = vpop.permute.xlu0 %688 }
 0x107   : > { %4465 = vst [vmem:[#allocation120_spill] sm:$0xff] %v2988_v26  ;;  %v4313_v26 = vrot.slane %v2998_v16, 7 }
 0x108   : > { %809 = vrot.lane.b32.xlu2 %v2588_v14, %s2175_s4  ;;  %v852_v14 = vrot.slane %v3005_v46, 1 }
 0x109   : > { %807 = vrot.lane.b32.xlu1 %v2591_v45, %s2175_s4  ;;  %v3017_v19 = vsel %vm234_vm0, %v282_v18, %v4313_v26 }
 0x10a   : > { %v2995_v20 = vpop.permute.xlu2 %710  ;;  %4470 = vst [vmem:[#allocation125_spill] sm:$0xff] %v3017_v19 }
 0x10b   : > { %4466 = vst [vmem:[#allocation121_spill] sm:$0xff] %v2995_v20  ;;  %v3000_v41 = vpop.permute.xlu1 %690 }
 0x10c   : > { %4467 = vst [vmem:[#allocation122_spill] sm:$0xff] %v3000_v41  ;;  %811 = vrot.lane.b32.xlu0 %v2607_v25, %s2175_s4 }
 0x10e   : > { %v3008_v31 = vpop.permute.xlu0 %694 }
 0x10f   : > { %4469 = vst [vmem:[#allocation124_spill] sm:$0xff] %v3008_v31 }
 0x110   : > { %815 = vrot.lane.b32.xlu2 %v3005_v46, %s2175_s4 }
 0x111   : > { %813 = vrot.lane.b32.xlu1 %v2604_v8, %s2175_s4 }
 0x112   : > { %v3019_v41 = vpop.permute.xlu2 %716 }
 0x113   : > { %4471 = vst [vmem:[#allocation126_spill] sm:$0xff] %v3019_v41  ;;  %v3021_v25 = vpop.permute.xlu1 %696 }
 0x114   : > { %4472 = vst [vmem:[#allocation127_spill] sm:$0xff] %v3021_v25  ;;  %817 = vrot.lane.b32.xlu0 %v3017_v19, %s2175_s4 }
 0x116   : > { %v3025_v20 = vpop.permute.xlu0 %700 }
 0x117   : > { %4473 = vst [vmem:[#allocation128_spill] sm:$0xff] %v3025_v20 }
 0x118   : > { %859 = vrot.lane.b32.xlu2 %v2319_v38, %s2176_s5 }
 0x119   : > { %857 = vrot.lane.b32.xlu1 %v2324_v40, %s2176_s5 }
 0x11a   : > { %v3031_v8 = vpop.permute.xlu2 %755 }
 0x11b   : > { %4474 = vst [vmem:[#allocation129_spill] sm:$0xff] %v3031_v8  ;;  %v3033_v18 = vpop.permute.xlu1 %702 }
 0x11c   : > { %4475 = vst [vmem:[#allocation130_spill] sm:$0xff] %v3033_v18  ;;  %861 = vrot.lane.b32.xlu0 %v2340_v49, %s2176_s5 }
 0x11e   : > { %v3037_v26 = vpop.permute.xlu0 %706 }
 0x11f   : > { %4476 = vst [vmem:[#allocation131_spill] sm:$0xff] %v3037_v26  ;;  %v4480_v26 = vld [vmem:[#allocation19_spill] sm:$0xff] }
 0x120   : > { %865 = vrot.lane.b32.xlu2 %v2337_v48, %s2176_s5 }
 0x121   : > { %863 = vrot.lane.b32.xlu1 %v2309_v34, %s2176_s5  ;;  %v4483_v34 = vld [vmem:[#allocation20_spill] sm:$0xff] }
 0x122   : > { %v3043_v20 = vpop.permute.xlu2 %761 }
 0x123   : > { %4477 = vst [vmem:[#allocation132_spill] sm:$0xff] %v3043_v20  ;;  %v3045_v38 = vpop.permute.xlu1 %708 }
 0x124   : > { %4478 = vst [vmem:[#allocation133_spill] sm:$0xff] %v3045_v38  ;;  %867 = vrot.lane.b32.xlu0 %v2359_v58, %s2176_s5  ;;  %v4485_v38 = vld [vmem:[#allocation21_spill] sm:$0xff]  ;;  %v4486_v58 = vld [vmem:[#allocation22_spill] sm:$0xff] }
 0x126   : > { %v3049_v40 = vpop.permute.xlu0 %712 }
 0x127   : > { %4479 = vst [vmem:[#allocation134_spill] sm:$0xff] %v3049_v40 }
 0x128   : > { %871 = vrot.lane.b32.xlu2 %v2373_v5, %s2176_s5 }
 0x129   : > { %869 = vrot.lane.b32.xlu1 %v4480_v26, %s2176_s5  ;;  %v4489_v26 = vld [vmem:[#allocation23_spill] sm:$0xff] }
 0x12a   : > { %v3055_v18 = vpop.permute.xlu2 %767 }
 0x12b   : > { %4481 = vst [vmem:[#allocation135_spill] sm:$0xff] %v3055_v18  ;;  %v3057_v48 = vpop.permute.xlu1 %714 }
 0x12c   : > { %4482 = vst [vmem:[#allocation136_spill] sm:$0xff] %v3057_v48  ;;  %873 = vrot.lane.b32.xlu0 %v4483_v34, %s2176_s5  ;;  %v4491_v48 = vld [vmem:[#allocation24_spill] sm:$0xff]  ;;  %v4492_v34 = vld [vmem:[#allocation25_spill] sm:$0xff] }
 0x12e   : > { %v3061_v20 = vpop.permute.xlu0 %718 }
 0x12f   : > { %4484 = vst [vmem:[#allocation137_spill] sm:$0xff] %v3061_v20 }
 0x130   : > { %877 = vrot.lane.b32.xlu2 %v4485_v38, %s2176_s5 }
 0x131   : > { %875 = vrot.lane.b32.xlu1 %v4486_v58, %s2176_s5  ;;  %v4494_v58 = vld [vmem:[#allocation26_spill] sm:$0xff] }
 0x132   : > { %v3067_v40 = vpop.permute.xlu2 %773 }
 0x133   : > { %4487 = vst [vmem:[#allocation21_spill] sm:$0xff] %v3067_v40  ;;  %v3069_v5 = vpop.permute.xlu1 %720 }
 0x134   : > { %4488 = vst [vmem:[#allocation138_spill] sm:$0xff] %v3069_v5  ;;  %879 = vrot.lane.b32.xlu0 %v4489_v26, %s2176_s5  ;;  %v4496_v5 = vld [vmem:[#allocation27_spill] sm:$0xff] }
 0x136   : > { %v3073_v18 = vpop.permute.xlu0 %757 }
 0x137   : > { %4490 = vst [vmem:[#allocation139_spill] sm:$0xff] %v3073_v18  ;;  %v4497_v18 = vld [vmem:[#allocation28_spill] sm:$0xff] }
 0x138   : > { %883 = vrot.lane.b32.xlu2 %v4491_v48, %s2176_s5 }
 0x139   : > { %881 = vrot.lane.b32.xlu1 %v4492_v34, %s2176_s5  ;;  %v4500_v34 = vld [vmem:[#allocation29_spill] sm:$0xff] }
 0x13a   : > { %v3079_v20 = vpop.permute.xlu2 %779 }
 0x13b   : > { %v3081_v8 = vpop.permute.xlu1 %759 }
 0x13c   : > { %4493 = vst [vmem:[#allocation140_spill] sm:$0xff] %v3081_v8  ;;  %885 = vrot.lane.b32.xlu0 %v4494_v58, %s2176_s5  ;;  %v4502_v8 = vld [vmem:[#allocation32_spill] sm:$0xff]  ;;  %v4503_v58 = vld [vmem:[#allocation33_spill] sm:$0xff] }
 0x13e   : > { %v3085_v40 = vpop.permute.xlu0 %763 }
 0x13f   : > { %4495 = vst [vmem:[#allocation141_spill] sm:$0xff] %v3085_v40 }
 0x140   : > { %889 = vrot.lane.b32.xlu2 %v4496_v5, %s2176_s5 }
 0x141   : > { %887 = vrot.lane.b32.xlu1 %v4497_v18, %s2176_s5  ;;  %v4506_v18 = vld [vmem:[#allocation36_spill] sm:$0xff] }
 0x142   : > { %v3091_v26 = vpop.permute.xlu2 %785 }
 0x143   : > { %4498 = vst [vmem:[#allocation142_spill] sm:$0xff] %v3091_v26  ;;  %v3093_v48 = vpop.permute.xlu1 %765  ;;  %v4516_v26 = vrot.slane %v2998_v16, 7  ;;  %v4518_v16 = vld [vmem:[#allocation51_spill] sm:$0xff] }
 0x144   : > { %4499 = vst [vmem:[#allocation143_spill] sm:$0xff] %v3093_v48  ;;  %891 = vrot.lane.b32.xlu0 %v4500_v34, %s2176_s5  ;;  %v4507_v48 = vld [vmem:[#allocation38_spill] sm:$0xff]  ;;  %v4508_v34 = vld [vmem:[#allocation39_spill] sm:$0xff] }
 0x146   : > { %v3097_v25 = vpop.permute.xlu0 %769 }
 0x147   : > { %4501 = vst [vmem:[#allocation144_spill] sm:$0xff] %v3097_v25 }
 0x148   : > { %895 = vrot.lane.b32.xlu2 %v4502_v8, %s2176_s5 }
 0x149   : > { %893 = vrot.lane.b32.xlu1 %v4503_v58, %s2176_s5 }
 0x14a   : > { %v3103_v40 = vpop.permute.xlu2 %791 }
 0x14b   : > { %4504 = vst [vmem:[#allocation33_spill] sm:$0xff] %v3103_v40  ;;  %v3105_v5 = vpop.permute.xlu1 %771 }
 0x14c   : > { %4505 = vst [vmem:[#allocation145_spill] sm:$0xff] %v3105_v5  ;;  %897 = vrot.lane.b32.xlu0 %v4506_v18, %s2176_s5  ;;  %v4511_v5 = vld [vmem:[#allocation44_spill] sm:$0xff]  ;;  %v4512_v18 = vld [vmem:[#allocation45_spill] sm:$0xff] }
 0x14e   : > { %v3109_v41 = vpop.permute.xlu0 %775 }
 0x150   : > { %901 = vrot.lane.b32.xlu2 %v4507_v48, %s2176_s5 }
 0x151   : > { %899 = vrot.lane.b32.xlu1 %v4508_v34, %s2176_s5  ;;  %v4514_v34 = vld [vmem:[#allocation48_spill] sm:$0xff] }
 0x152   : > { %v3115_v25 = vpop.permute.xlu2 %797 }
 0x153   : > { %4509 = vst [vmem:[#allocation146_spill] sm:$0xff] %v3115_v25  ;;  %v3117_v8 = vpop.permute.xlu1 %777 }
 0x154   : > { %903 = vrot.lane.b32.xlu0 %v2582_v54, %s2176_s5  ;;  %v3138_v54 = vsel %vm234_vm0, %v4516_v26, 0.0 }
 0x156   : > { %v3121_v40 = vpop.permute.xlu0 %781 }
 0x157   : > { %4510 = vst [vmem:[#allocation147_spill] sm:$0xff] %v3121_v40 }
 0x158   : > { %907 = vrot.lane.b32.xlu2 %v4511_v5, %s2176_s5  ;;  %v853_v5 = vrot.slane %v3017_v19, 1 }
 0x159   : > { %905 = vrot.lane.b32.xlu1 %v4512_v18, %s2176_s5  ;;  %v855_v18 = vrot.slane %v3138_v54, 1 }
 0x15a   : > { %v3127_v31 = vpop.permute.xlu2 %803 }
 0x15b   : > { %4513 = vst [vmem:[#allocation148_spill] sm:$0xff] %v3127_v31  ;;  %v3129_v48 = vpop.permute.xlu1 %783  ;;  %v3154_v26 = vsel %vm400_vm1, %v853_v5, %v855_v18 }
 0x15c   : > { %909 = vrot.lane.b32.xlu0 %v4514_v34, %s2176_s5  ;;  %4519 = vst [vmem:[#allocation150_spill] sm:$0xff] %v3154_v26 }
 0x15e   : > { %v3133_v25 = vpop.permute.xlu0 %787 }
 0x15f   : > { %4515 = vst [vmem:[#allocation48_spill] sm:$0xff] %v3133_v25 }
 0x160   : > { %913 = vrot.lane.b32.xlu2 %v2628_v30, %s2176_s5 }
 0x161   : > { %911 = vrot.lane.b32.xlu1 %v2632_v17, %s2176_s5  ;;  %v3159_v17 = vsel %vm400_vm1, %v852_v14, %v853_v5  ;;  %v4525_v5 = vld [vmem:[#allocation53_spill] sm:$0xff] }
 0x162   : > { %v3146_v31 = vpop.permute.xlu2 %809  ;;  %4521 = vst [vmem:[#allocation152_spill] sm:$0xff] %v3159_v17 }
 0x163   : > { %4517 = vst [vmem:[#allocation149_spill] sm:$0xff] %v3146_v31  ;;  %v3149_v25 = vpop.permute.xlu1 %789 }
 0x164   : > { %915 = vrot.lane.b32.xlu0 %v4518_v16, %s2176_s5  ;;  %v4523_v16 = vld [vmem:[#allocation52_spill] sm:$0xff] }
 0x166   : > { %v3156_v30 = vpop.permute.xlu0 %793 }
 0x167   : > { %4520 = vst [vmem:[#allocation151_spill] sm:$0xff] %v3156_v30  ;;  %v4543_v30 = vld [vmem:[#allocation71_spill] sm:$0xff] }
 0x168   : > { %919 = vrot.lane.b32.xlu2 %v3154_v26, %s2176_s5 }
 0x169   : > { %917 = vrot.lane.b32.xlu1 %v3159_v17, %s2176_s5  ;;  %v4527_v17 = vld [vmem:[#allocation54_spill] sm:$0xff] }
 0x16a   : > { %v3165_v31 = vpop.permute.xlu2 %815 }
 0x16b   : > { %4522 = vst [vmem:[#allocation153_spill] sm:$0xff] %v3165_v31  ;;  %v3167_v40 = vpop.permute.xlu1 %795 }
 0x16c   : > { %958 = vrot.lane.b32.xlu0 %v4523_v16, %s2177_s6 }
 0x16e   : > { %v3171_v18 = vpop.permute.xlu0 %799 }
 0x16f   : > { %4524 = vst [vmem:[#allocation52_spill] sm:$0xff] %v3171_v18 }
 0x170   : > { %962 = vrot.lane.b32.xlu2 %v2667_v1, %s2177_s6 }
 0x171   : > { %960 = vrot.lane.b32.xlu1 %v4525_v5, %s2177_s6  ;;  %v4530_v5 = vld [vmem:[#allocation57_spill] sm:$0xff] }
 0x172   : > { %v3177_v14 = vpop.permute.xlu2 %859 }
 0x173   : > { %4526 = vst [vmem:[#allocation53_spill] sm:$0xff] %v3177_v14  ;;  %v3179_v26 = vpop.permute.xlu1 %801 }
 0x174   : > { %964 = vrot.lane.b32.xlu0 %v4527_v17, %s2177_s6 }
 0x176   : > { %v3183_v31 = vpop.permute.xlu0 %805 }
 0x177   : > { %4528 = vst [vmem:[#allocation154_spill] sm:$0xff] %v3183_v31  ;;  %v4532_v31 = vld [vmem:[#allocation59_spill] sm:$0xff] }
 0x178   : > { %968 = vrot.lane.b32.xlu2 %v2688_v28, %s2177_s6 }
 0x179   : > { %966 = vrot.lane.b32.xlu1 %v2674_v23, %s2177_s6  ;;  %v4535_v23 = vld [vmem:[#allocation61_spill] sm:$0xff] }
 0x17a   : > { %v3189_v16 = vpop.permute.xlu2 %865 }
 0x17b   : > { %4529 = vst [vmem:[#allocation155_spill] sm:$0xff] %v3189_v16  ;;  %v3191_v18 = vpop.permute.xlu1 %807 }
 0x17c   : > { %970 = vrot.lane.b32.xlu0 %v4530_v5, %s2177_s6  ;;  %v4537_v5 = vld [vmem:[#allocation63_spill] sm:$0xff] }
 0x17e   : > { %v3195_v14 = vpop.permute.xlu0 %811 }
 0x17f   : > { %4531 = vst [vmem:[#allocation156_spill] sm:$0xff] %v3195_v14 }
 0x180   : > { %974 = vrot.lane.b32.xlu2 %v2710_v50, %s2177_s6 }
 0x181   : > { %972 = vrot.lane.b32.xlu1 %v4532_v31, %s2177_s6  ;;  %v4539_v31 = vld [vmem:[#allocation65_spill] sm:$0xff] }
 0x182   : > { %v3201_v17 = vpop.permute.xlu2 %871 }
 0x183   : > { %4533 = vst [vmem:[#allocation157_spill] sm:$0xff] %v3201_v17  ;;  %v3203_v28 = vpop.permute.xlu1 %813 }
 0x184   : > { %4534 = vst [vmem:[#allocation158_spill] sm:$0xff] %v3203_v28  ;;  %976 = vrot.lane.b32.xlu0 %v4535_v23, %s2177_s6  ;;  %v4541_v23 = vld [vmem:[#allocation68_spill] sm:$0xff] }
 0x186   : > { %v3207_v16 = vpop.permute.xlu0 %817 }
 0x187   : > { %4536 = vst [vmem:[#allocation159_spill] sm:$0xff] %v3207_v16 }
 0x188   : > { %980 = vrot.lane.b32.xlu2 %v2733_v15, %s2177_s6 }
 0x189   : > { %978 = vrot.lane.b32.xlu1 %v4537_v5, %s2177_s6 }
 0x18a   : > { %v3213_v14 = vpop.permute.xlu2 %877 }
 0x18b   : > { %v3215_v50 = vpop.permute.xlu1 %857 }
 0x18c   : > { %4538 = vst [vmem:[#allocation63_spill] sm:$0xff] %v3215_v50  ;;  %982 = vrot.lane.b32.xlu0 %v4539_v31, %s2177_s6  ;;  %v956_v50 = vrot.slane %v3138_v54, 2 }
 0x18e   : > { %v3219_v17 = vpop.permute.xlu0 %861 }
 0x18f   : > { %4540 = vst [vmem:[#allocation160_spill] sm:$0xff] %v3219_v17 }
 0x190   : > { %986 = vrot.lane.b32.xlu2 %v2759_v13, %s2177_s6 }
 0x191   : > { %984 = vrot.lane.b32.xlu1 %v4541_v23, %s2177_s6  ;;  %v4546_v23 = vld [vmem:[#allocation77_spill] sm:$0xff] }
 0x192   : > { %v3225_v16 = vpop.permute.xlu2 %883 }
 0x193   : > { %v3227_v15 = vpop.permute.xlu1 %863 }
 0x194   : > { %4542 = vst [vmem:[#allocation161_spill] sm:$0xff] %v3227_v15  ;;  %988 = vrot.lane.b32.xlu0 %v4543_v30, %s2177_s6  ;;  %v4548_v30 = vld [vmem:[#allocation80_spill] sm:$0xff] }
 0x196   : > { %v3231_v28 = vpop.permute.xlu0 %867 }
 0x197   : > { %4544 = vst [vmem:[#allocation162_spill] sm:$0xff] %v3231_v28 }
 0x198   : > { %992 = vrot.lane.b32.xlu2 %v2784_v60, %s2177_s6 }
 0x199   : > { %990 = vrot.lane.b32.xlu1 %v2766_v39, %s2177_s6  ;;  %v4550_v39 = vld [vmem:[#allocation83_spill] sm:$0xff] }
 0x19a   : > { %v3237_v31 = vpop.permute.xlu2 %889 }
 0x19b   : > { %v3239_v13 = vpop.permute.xlu1 %869 }
 0x19c   : > { %4545 = vst [vmem:[#allocation163_spill] sm:$0xff] %v3239_v13  ;;  %994 = vrot.lane.b32.xlu0 %v4546_v23, %s2177_s6 }
 0x19e   : > { %v3243_v17 = vpop.permute.xlu0 %873 }
 0x19f   : > { %4547 = vst [vmem:[#allocation77_spill] sm:$0xff] %v3243_v17 }
 0x1a0   : > { %998 = vrot.lane.b32.xlu2 %v2810_v47, %s2177_s6 }
 0x1a1   : > { %996 = vrot.lane.b32.xlu1 %v4548_v30, %s2177_s6 }
 0x1a2   : > { %v3249_v28 = vpop.permute.xlu2 %895 }
 0x1a3   : > { %v3251_v60 = vpop.permute.xlu1 %875 }
 0x1a4   : > { %4549 = vst [vmem:[#allocation80_spill] sm:$0xff] %v3251_v60  ;;  %1000 = vrot.lane.b32.xlu0 %v4550_v39, %s2177_s6  ;;  %v4552_v39 = vld [vmem:[#allocation92_spill] sm:$0xff] }
 0x1a6   : > { %v880_v15 = vpop.permute.xlu0 %879 }
 0x1a8   : > { %1004 = vrot.lane.b32.xlu2 %v2835_v42, %s2177_s6 }
 0x1a9   : > { %1002 = vrot.lane.b32.xlu1 %v2817_v3, %s2177_s6  ;;  %v953_v3 = vrot.slane %v3005_v46, 2 }
 0x1aa   : > { %v3259_v17 = vpop.permute.xlu2 %901 }
 0x1ab   : > { %4551 = vst [vmem:[#allocation164_spill] sm:$0xff] %v3259_v17  ;;  %v3261_v47 = vpop.permute.xlu1 %881  ;;  %v954_v17 = vrot.slane %v3017_v19, 2 }
 0x1ac   : > { %1006 = vrot.lane.b32.xlu0 %v2829_v44, %s2177_s6 }
 0x1ad   : > { %v3298_v46 = vsel %vm577_vm2, %v954_v17, %v956_v50 }
 0x1ae   : > { %v3265_v13 = vpop.permute.xlu0 %885  ;;  %4555 = vst [vmem:[#allocation167_spill] sm:$0xff] %v3298_v46 }
 0x1b0   : > { %1010 = vrot.lane.b32.xlu2 %v2861_v29, %s2177_s6 }
 0x1b1   : > { %1008 = vrot.lane.b32.xlu1 %v4552_v39, %s2177_s6  ;;  %v3286_v39 = vsel %vm577_vm2, %v953_v3, %v954_v17 }
 0x1b2   : > { %v3271_v60 = vpop.permute.xlu2 %907  ;;  %4554 = vst [vmem:[#allocation166_spill] sm:$0xff] %v3286_v39 }
 0x1b3   : > { %4553 = vst [vmem:[#allocation165_spill] sm:$0xff] %v3271_v60  ;;  %v3273_v42 = vpop.permute.xlu1 %887 }
 0x1b4   : > { %1012 = vrot.lane.b32.xlu0 %v2854_v11, %s2177_s6 }
 0x1b6   : > { %v3279_v44 = vpop.permute.xlu0 %891 }
 0x1b8   : > { %1016 = vrot.lane.b32.xlu2 %v2880_v4, %s2177_s6 }
 0x1b9   : > { %1014 = vrot.lane.b32.xlu1 %v2868_v0, %s2177_s6 }
 0x1ba   : > { %v3288_v60 = vpop.permute.xlu2 %913 }
 0x1bb   : > { %v3291_v11 = vpop.permute.xlu1 %893 }
 0x1bc   : > { %1018 = vrot.lane.b32.xlu0 %v3286_v39, %s2177_s6 }
 0x1be   : > { %v3295_v19 = vpop.permute.xlu0 %897 }
 0x1c0   : > { %1054 = vrot.lane.b32.xlu2 %v2289_v24, %s2178_s7  ;;  %v4561_v24 = vld [vmem:[#allocation88_spill] sm:$0xff] }
 0x1c1   : > { %1020 = vrot.lane.b32.xlu1 %v3298_v46, %s2177_s6  ;;  %s1975_s6 = sshll.u32 %s161_s29, 8 }
 0x1c2   : > { %v3304_v3 = vpop.permute.xlu2 %919 }
 0x1c3   : > { %4556 = vst [vmem:[#allocation168_spill] sm:$0xff] %v3304_v3  ;;  %v3306_v54 = vpop.permute.xlu1 %899  ;;  %v1354_v3 = vsel %vm1342_vm3, %v2365_v62, %v4561_v24 }
 0x1c4   : > { %1056 = vrot.lane.b32.xlu0 %v2283_v22, %s2178_s7  ;;  %v1387_v0 = vsel %vm1375_vm4, %v1354_v3, %v2934_v53  ;;  %v4562_v3 = vld [vmem:[#allocation94_spill] sm:$0xff] }
 0x1c6   : > { %v3310_v39 = vpop.permute.xlu0 %903 }
 0x1c8   : > { %1060 = vrot.lane.b32.xlu2 %v2306_v33, %s2178_s7 }
 0x1c9   : > { %1058 = vrot.lane.b32.xlu1 %v2313_v36, %s2178_s7 }
 0x1ca   : > { %v3316_v17 = vpop.permute.xlu2 %962 }
 0x1cb   : > { %4557 = vst [vmem:[#allocation169_spill] sm:$0xff] %v3316_v17  ;;  %v3318_v50 = vpop.permute.xlu1 %905 }
 0x1cc   : > { %1062 = vrot.lane.b32.xlu0 %v2344_v51, %s2178_s7 }
 0x1ce   : > { %v3322_v46 = vpop.permute.xlu0 %909 }
 0x1d0   : > { %1066 = vrot.lane.b32.xlu2 %v2368_v63, %s2178_s7 }
 0x1d1   : > { %1064 = vrot.lane.b32.xlu1 %v2347_v52, %s2178_s7 }
 0x1d2   : > { %v3328_v4 = vpop.permute.xlu2 %968 }
 0x1d3   : > { %4558 = vst [vmem:[#allocation170_spill] sm:$0xff] %v3328_v4  ;;  %v3330_v33 = vpop.permute.xlu1 %911 }
 0x1d4   : > { %1068 = vrot.lane.b32.xlu0 %v2365_v62, %s2178_s7 }
 0x1d6   : > { %v3334_v22 = vpop.permute.xlu0 %915 }
 0x1d8   : > { %1072 = vrot.lane.b32.xlu2 %v2381_v9, %s2178_s7 }
 0x1d9   : > { %1070 = vrot.lane.b32.xlu1 %v2384_v10, %s2178_s7 }
 0x1da   : > { %v3340_v51 = vpop.permute.xlu2 %974 }
 0x1db   : > { %4559 = vst [vmem:[#allocation171_spill] sm:$0xff] %v3340_v51  ;;  %v3342_v17 = vpop.permute.xlu1 %917  ;;  %v1420_v51 = vsel %vm1408_vm5, %v1387_v0, %v3117_v8  ;;  %v1357_v8 = vsel %vm1342_vm3, %v2423_v43, %v4562_v3 }
 0x1dc   : > { %4560 = vst [vmem:[#allocation172_spill] sm:$0xff] %v3342_v17  ;;  %1074 = vrot.lane.b32.xlu0 %v2423_v43, %s2178_s7  ;;  %v1453_v17 = vsel %vm1441_vm6, %v1420_v51, %v880_v15  ;;  %v1390_v0 = vsel %vm1375_vm4, %v1357_v8, %v2946_v37 }
 0x1dd   : > { %v1423_v51 = vsel %vm1408_vm5, %v1390_v0, %v3129_v48  ;;  %v1360_v48 = vsel %vm1342_vm3, %v2437_v56, %v2873_v2  ;;  %v4563_v2 = vld [vmem:[#allocation84_spill] sm:$0xff] }
 0x1de   : > { %v3346_v4 = vpop.permute.xlu0 %958  ;;  %v1393_v3 = vsel %vm1375_vm4, %v1360_v48, %v2958_v32 }
 0x1e0   : > { %1078 = vrot.lane.b32.xlu2 %v2440_v57, %s2178_s7 }
 0x1e1   : > { %1076 = vrot.lane.b32.xlu1 %v2416_v35, %s2178_s7 }
 0x1e2   : > { %v981_v52 = vpop.permute.xlu2 %980 }
 0x1e3   : > { %v3361_v24 = vsel %vm1474_vm7, %v1453_v17, %v981_v52  ;;  %v3363_v62 = vpop.permute.xlu1 %960  ;;  %v1456_v52 = vsel %vm1441_vm6, %v1423_v51, %v3265_v13  ;;  %v1426_v13 = vsel %vm1408_vm5, %v1393_v3, %v3149_v25  ;;  %v1363_v25 = vsel %vm1342_vm3, %v2494_v61, %v2888_v12  ;;  %v4564_v12 = vld [vmem:[#allocation69_spill] sm:$0xff]  ;;  %v4565_v3 = vld [vmem:[#allocation104_spill] sm:$0xff] }
 0x1e4   : > { %1080 = vrot.lane.b32.xlu0 %v2437_v56, %s2178_s7  ;;  %v1459_v8 = vsel %vm1441_vm6, %v1426_v13, %v3279_v44  ;;  %v1353_v44 = vsel %vm1342_vm3, %v2368_v63, %v4563_v2  ;;  %v4566_v13 = vld [vmem:[#allocation30_spill] sm:$0xff] }
 0x1e5   : > { %v4568_v2 = vld [vmem:[#allocation118_spill] sm:$0xff] }
 0x1e6   : > { %v3367_v53 = vpop.permute.xlu0 %964 }
 0x1e8   : > { %1084 = vrot.lane.b32.xlu2 %v2453_v6, %s2178_s7 }
 0x1e9   : > { %1082 = vrot.lane.b32.xlu1 %v2456_v7, %s2178_s7 }
 0x1ea   : > { %v987_v15 = vpop.permute.xlu2 %986 }
 0x1eb   : > { %v3383_v17 = vsel %vm1474_vm7, %v1456_v52, %v987_v15  ;;  %v3385_v43 = vpop.permute.xlu1 %966  ;;  %v1396_v52 = vsel %vm1375_vm4, %v1363_v25, %v2970_v59 }
 0x1ec   : > { %1086 = vrot.lane.b32.xlu0 %v2494_v61, %s2178_s7  ;;  %v1429_v15 = vsel %vm1408_vm5, %v1396_v52, %v3167_v40  ;;  %v4570_v52 = vld [vmem:[#allocation147_spill] sm:$0xff] }
 0x1ed   : > { %v1462_v63 = vsel %vm1441_vm6, %v1429_v15, %v3295_v19 }
 0x1ee   : > { %v3389_v37 = vpop.permute.xlu0 %970 }
 0x1f0   : > { %1102 = vrot.lane.b32.xlu2 %v2591_v45, %s2178_s7 }
 0x1f1   : > { %1088 = vrot.lane.b32.xlu1 %v2488_v55, %s2178_s7 }
 0x1f2   : > { %v993_v0 = vpop.permute.xlu2 %992 }
 0x1f3   : > { %v3405_v51 = vsel %vm1474_vm7, %v1459_v8, %v993_v0  ;;  %v3407_v56 = vpop.permute.xlu1 %972  ;;  %v1366_v8 = vsel %vm1342_vm3, %v4566_v13, %v4565_v3  ;;  %v4577_v3 = vld [vmem:[#allocation96_spill] sm:$0xff] }
 0x1f4   : > { %1182 = vrot.lane.b32.xlu0 %v4503_v58, %s2179_s8  ;;  %v1386_v58 = vsel %vm1375_vm4, %v1353_v44, %v2972_v27 }
 0x1f5   : > { %v1419_v61 = vsel %vm1408_vm5, %v1386_v58, %v3109_v41 }
 0x1f6   : > { %v3411_v32 = vpop.permute.xlu0 %976  ;;  %v1452_v27 = vsel %vm1441_vm6, %v1419_v61, %v3213_v14  ;;  %v4571_v61 = vld [vmem:[#allocation75_spill] sm:$0xff] }
 0x1f8   : > { %1278 = vrot.lane.b32.xlu2 %v4546_v23, %s2180_s9  ;;  %v1355_v23 = vsel %vm1342_vm3, %v2384_v10, %v4564_v12  ;;  %v4572_v12 = vld [vmem:[#allocation120_spill] sm:$0xff] }
 0x1f9   : > { %1198 = vrot.lane.b32.xlu1 %v4514_v34, %s2179_s8  ;;  %v1388_v34 = vsel %vm1375_vm4, %v1355_v23, %v2976_v21  ;;  %v4567_v21 = vld [vmem:[#allocation90_spill] sm:$0xff] }
 0x1fa   : > { %v999_v59 = vpop.permute.xlu2 %998  ;;  %v1421_v19 = vsel %vm1408_vm5, %v1388_v34, %v3079_v20  ;;  %v1356_v25 = vsel %vm1342_vm3, %v2381_v9, %v4567_v21  ;;  %v4569_v20 = vld [vmem:[#allocation119_spill] sm:$0xff]  ;;  %v4578_v21 = vld [vmem:[#allocation121_spill] sm:$0xff] }
 0x1fb   : > { %v3439_v48 = vsel %vm1474_vm7, %v1462_v63, %v999_v59  ;;  %v979_v40 = vpop.permute.xlu1 %978  ;;  %v1454_v10 = vsel %vm1441_vm6, %v1421_v19, %v3261_v47  ;;  %v1389_v47 = vsel %vm1375_vm4, %v1356_v25, %v4569_v20  ;;  %v4575_v34 = vld [vmem:[#allocation107_spill] sm:$0xff]  ;;  %v4576_v19 = vld [vmem:[#allocation41_spill] sm:$0xff]  ;;  %v4580_v20 = vld [vmem:[#allocation48_spill] sm:$0xff] }
 0x1fc   : > { %v3444_v41 = vsel %vm1474_vm7, %v1452_v27, %v979_v40  ;;  %1294 = vrot.lane.b32.xlu0 %v2861_v29, %s2180_s9  ;;  %v1399_v29 = vsel %vm1375_vm4, %v1366_v8, %v4568_v2  ;;  %v1422_v58 = vsel %vm1408_vm5, %v1389_v47, %v4570_v52  ;;  %v4574_v27 = vld [vmem:[#allocation142_spill] sm:$0xff]  ;;  %v1359_v8 = vsel %vm1342_vm3, %v2440_v57, %v4577_v3  ;;  %v4581_v52 = vld [vmem:[#allocation81_spill] sm:$0xff] }
 0x1fd   : > { %v1432_v44 = vsel %vm1408_vm5, %v1399_v29, %v3179_v26  ;;  %v1455_v63 = vsel %vm1441_vm6, %v1422_v58, %v3225_v16  ;;  %v4579_v2 = vld [vmem:[#allocation122_spill] sm:$0xff] }
 0x1fe   : > { %v983_v14 = vpop.permute.xlu0 %982  ;;  %v1465_v9 = vsel %vm1441_vm6, %v1432_v44, %v3310_v39  ;;  %v4573_v39 = vld [vmem:[#allocation43_spill] sm:$0xff] }
 0x1ff   : > { %v3456_v0 = vsel %vm1474_vm7, %v1454_v10, %v983_v14  ;;  %v1369_v10 = vsel %vm1342_vm3, %v4576_v19, %v4575_v34  ;;  %v4588_v34 = vld [vmem:[#allocation127_spill] sm:$0xff] }
 0x200   : > { %1166 = vrot.lane.b32.xlu2 %v4485_v38, %s2179_s8  ;;  %v1358_v38 = vsel %vm1342_vm3, %v2416_v35, %v4571_v61  ;;  %v1402_v25 = vsel %vm1375_vm4, %v1369_v10, %v4578_v21  ;;  %v4589_v10 = vld [vmem:[#allocation158_spill] sm:$0xff] }
 0x201   : > { %1150 = vrot.lane.b32.xlu1 %v2340_v49, %s2179_s8  ;;  %v1391_v49 = vsel %vm1375_vm4, %v1358_v38, %v4572_v12  ;;  %v1435_v29 = vsel %vm1408_vm5, %v1402_v25, %v3191_v18  ;;  %v4584_v38 = vld [vmem:[#allocation33_spill] sm:$0xff]  ;;  %v4592_v25 = vld [vmem:[#allocation151_spill] sm:$0xff] }
 0x202   : > { %v1005_v15 = vpop.permute.xlu2 %1004  ;;  %v1424_v40 = vsel %vm1408_vm5, %v1391_v49, %v4574_v27  ;;  %v1468_v57 = vsel %vm1441_vm6, %v1435_v29, %v3322_v46  ;;  %v4583_v46 = vld [vmem:[#allocation32_spill] sm:$0xff]  ;;  %v4586_v27 = vld [vmem:[#allocation99_spill] sm:$0xff] }
 0x203   : > { %v3481_v59 = vsel %vm1474_vm7, %v1465_v9, %v1005_v15  ;;  %v985_v26 = vpop.permute.xlu1 %984  ;;  %v1457_v35 = vsel %vm1441_vm6, %v1424_v40, %v3273_v42  ;;  %v1392_v42 = vsel %vm1375_vm4, %v1359_v8, %v4579_v2  ;;  %v4582_v15 = vld [vmem:[#allocation124_spill] sm:$0xff]  ;;  %v1362_v40 = vsel %vm1342_vm3, %v2453_v6, %v4586_v27  ;;  %v4591_v8 = vld [vmem:[#allocation66_spill] sm:$0xff]  ;;  %v4593_v29 = vld [vmem:[#allocation87_spill] sm:$0xff] }
 0x204   : > { %v3486_v23 = vsel %vm1474_vm7, %v1455_v63, %v985_v26  ;;  %1104 = vrot.lane.b32.xlu0 %v4573_v39, %s2178_s7  ;;  %v1425_v47 = vsel %vm1408_vm5, %v1392_v42, %v4580_v20  ;;  %v4585_v26 = vld [vmem:[#allocation110_spill] sm:$0xff]  ;;  %v2085_v21 = vunpack.i.l.bf16 %v4591_v8  ;;  %v4594_v20 = vld [vmem:[#allocation112_spill] sm:$0xff]  ;;  %v4601_v27 = vld [vmem:[#allocation129_spill] sm:$0xff] }
 0x205   : > { %v1458_v58 = vsel %vm1441_vm6, %v1425_v47, %v3237_v31  ;;  %v1372_v12 = vsel %vm1342_vm3, %v4573_v39, %v4585_v26  ;;  %v4590_v39 = vld [vmem:[#allocation50_spill] sm:$0xff]  ;;  %v2090_v47 = vunpack.i.l.bf16 %v4594_v20  ;;  %v4600_v26 = vld [vmem:[#allocation31_spill] sm:$0xff] }
 0x206   : > { %v989_v16 = vpop.permute.xlu0 %988 }
 0x207   : > { %v3498_v14 = vsel %vm1474_vm7, %v1457_v35, %v989_v16  ;;  %v4587_v35 = vld [vmem:[#allocation126_spill] sm:$0xff] }
 0x208   : > { %1262 = vrot.lane.b32.xlu2 %v4537_v5, %s2180_s9  ;;  %v1361_v5 = vsel %vm1342_vm3, %v2456_v7, %v4581_v52  ;;  %v1405_v16 = vsel %vm1375_vm4, %v1372_v12, %v4587_v35  ;;  %v4602_v35 = vld [vmem:[#allocation23_spill] sm:$0xff] }
 0x209   : > { %1246 = vrot.lane.b32.xlu1 %v2667_v1, %s2180_s9  ;;  %v1394_v1 = vsel %vm1375_vm4, %v1361_v5, %v4582_v15  ;;  %v1438_v3 = vsel %vm1408_vm5, %v1405_v16, %v4589_v10  ;;  %v4595_v5 = vld [vmem:[#allocation128_spill] sm:$0xff]  ;;  %v4597_v15 = vld [vmem:[#allocation146_spill] sm:$0xff]  ;;  %v4605_v10 = vld [vmem:[#allocation13_spill] sm:$0xff] }
 0x20a   : > { %v1011_v44 = vpop.permute.xlu2 %1010  ;;  %v1427_v63 = vsel %vm1408_vm5, %v1394_v1, %v4584_v38  ;;  %v1471_v2 = vsel %vm1441_vm6, %v1438_v3, %v3334_v22  ;;  %v4596_v22 = vld [vmem:[#allocation95_spill] sm:$0xff]  ;;  %v4598_v1 = vld [vmem:[#allocation6_spill] sm:$0xff]  ;;  %v4606_v3 = vld [vmem:[#allocation52_spill] sm:$0xff] }
 0x20b   : > { %v3523_v9 = vsel %vm1474_vm7, %v1468_v57, %v1011_v44  ;;  %v991_v18 = vpop.permute.xlu1 %990  ;;  %v1460_v7 = vsel %vm1441_vm6, %v1427_v63, %v3291_v11  ;;  %v1395_v11 = vsel %vm1375_vm4, %v1362_v40, %v4588_v34  ;;  %v4603_v16 = vld [vmem:[#allocation130_spill] sm:$0xff]  ;;  %v4604_v34 = vld [vmem:[#allocation63_spill] sm:$0xff] }
 0x20c   : > { %v3528_v61 = vsel %vm1474_vm7, %v1458_v58, %v991_v18  ;;  %1184 = vrot.lane.b32.xlu0 %v4583_v46, %s2179_s8  ;;  %v1428_v6 = vsel %vm1408_vm5, %v1395_v11, %v4592_v25  ;;  %v1343_v46 = vsel %vm1342_vm3, %v4598_v1, %v2085_v21 }
 0x20d   : > { %v1461_v57 = vsel %vm1441_vm6, %v1428_v6, %v3249_v28  ;;  %v1376_v63 = vsel %vm1375_vm4, %v1343_v46, %v2090_v47  ;;  %v4607_v6 = vld [vmem:[#allocation93_spill] sm:$0xff] }
 0x20e   : > { %v995_v31 = vpop.permute.xlu0 %994  ;;  %v1409_v40 = vsel %vm1408_vm5, %v1376_v63, %v4601_v27  ;;  %v4614_v63 = vld [vmem:[#allocation113_spill] sm:$0xff] }
 0x20f   : > { %v3540_v49 = vsel %vm1474_vm7, %v1460_v7, %v995_v31  ;;  %v4599_v31 = vld [vmem:[#allocation102_spill] sm:$0xff]  ;;  %v1442_v11 = vsel %vm1441_vm6, %v1409_v40, %v4604_v34  ;;  %v4615_v27 = vld [vmem:[#allocation105_spill] sm:$0xff] }
 0x210   : > { %1280 = vrot.lane.b32.xlu2 %v4548_v30, %s2180_s9  ;;  %v1364_v30 = vsel %vm1342_vm3, %v2488_v55, %v4593_v29  ;;  %v1365_v12 = vsel %vm1342_vm3, %v4600_v26, %v4599_v31  ;;  %v1475_v21 = vsel %vm1474_vm7, %v1442_v11, %v3346_v4  ;;  %v4609_v29 = vld [vmem:[#allocation164_spill] sm:$0xff]  ;;  %v4616_v40 = vld [vmem:[#allocation34_spill] sm:$0xff]  ;;  %v4619_v34 = vld [vmem:[#allocation133_spill] sm:$0xff] }
 0x211   : > { %1200 = vrot.lane.b32.xlu1 %v4590_v39, %s2179_s8  ;;  %v1397_v58 = vsel %vm1375_vm4, %v1364_v30, %v4595_v5  ;;  %v4611_v4 = vld [vmem:[#allocation148_spill] sm:$0xff]  ;;  %v4620_v11 = vld [vmem:[#allocation161_spill] sm:$0xff] }
 0x212   : > { %v1017_v42 = vpop.permute.xlu2 %1016  ;;  %v1430_v55 = vsel %vm1408_vm5, %v1397_v58, %v4597_v15  ;;  %v4612_v15 = vld [vmem:[#allocation70_spill] sm:$0xff] }
 0x213   : > { %v3567_v44 = vsel %vm1474_vm7, %v1471_v2, %v1017_v42  ;;  %v997_v52 = vpop.permute.xlu1 %996  ;;  %v1463_v28 = vsel %vm1441_vm6, %v1430_v55, %v3306_v54  ;;  %v1398_v54 = vsel %vm1375_vm4, %v1365_v12, %v4603_v16  ;;  %v4608_v2 = vld [vmem:[#allocation35_spill] sm:$0xff]  ;;  %v4613_v55 = vld [vmem:[#allocation10_spill] sm:$0xff] }
 0x214   : > { %v3572_v18 = vsel %vm1474_vm7, %v1461_v57, %v997_v52  ;;  %1296 = vrot.lane.b32.xlu0 %v4596_v22, %s2180_s9  ;;  %v1431_v39 = vsel %vm1408_vm5, %v1398_v54, %v4606_v3  ;;  %v1367_v42 = vsel %vm1342_vm3, %v4608_v2, %v4607_v6  ;;  %v4610_v52 = vld [vmem:[#allocation131_spill] sm:$0xff]  ;;  %v1346_v46 = vsel %vm1342_vm3, %v4613_v55, %v4612_v15  ;;  %v4618_v54 = vld [vmem:[#allocation54_spill] sm:$0xff] }
 0x215   : > { %v1464_v30 = vsel %vm1441_vm6, %v1431_v39, %v4609_v29  ;;  %v1400_v5 = vsel %vm1375_vm4, %v1367_v42, %v4610_v52  ;;  %v1379_v31 = vsel %vm1375_vm4, %v1346_v46, %v4614_v63  ;;  %v4621_v3 = vld [vmem:[#allocation47_spill] sm:$0xff]  ;;  %v4622_v39 = vld [vmem:[#allocation154_spill] sm:$0xff]  ;;  %v4624_v29 = vld [vmem:[#allocation40_spill] sm:$0xff] }
 0x216   : > { %v1001_v38 = vpop.permute.xlu0 %1000  ;;  %v1433_v22 = vsel %vm1408_vm5, %v1400_v5, %v4611_v4  ;;  %v4623_v42 = vld [vmem:[#allocation98_spill] sm:$0xff]  ;;  %v4628_v46 = vld [vmem:[#allocation149_spill] sm:$0xff] }
 0x217   : > { %v3584_v7 = vsel %vm1474_vm7, %v1463_v28, %v1001_v38  ;;  %v1466_v28 = vsel %vm1441_vm6, %v1433_v22, %v3318_v50  ;;  %v4626_v22 = vld [vmem:[#allocation134_spill] sm:$0xff] }
 0x218   : > { %1168 = vrot.lane.b32.xlu2 %v4602_v35, %s2179_s8  ;;  %v4617_v35 = vld [vmem:[#allocation132_spill] sm:$0xff] }
 0x219   : > { %1152 = vrot.lane.b32.xlu1 %v4605_v10, %s2179_s8  ;;  %v1412_v16 = vsel %vm1408_vm5, %v1379_v31, %v4617_v35 }
 0x21a   : > { %v1055_v25 = vpop.permute.xlu2 %1054  ;;  %v1445_v10 = vsel %vm1441_vm6, %v1412_v16, %v4620_v11 }
 0x21b   : > { %v3609_v47 = vsel %vm1507_vm8, %v1475_v21, %v1055_v25  ;;  %v1003_v57 = vpop.permute.xlu1 %1002  ;;  %v1478_v25 = vsel %vm1474_vm7, %v1445_v10, %v3367_v53  ;;  %v4627_v53 = vld [vmem:[#allocation67_spill] sm:$0xff]  ;;  %v4633_v10 = vld [vmem:[#allocation49_spill] sm:$0xff] }
 0x21c   : > { %v3614_v58 = vsel %vm1474_vm7, %v1464_v30, %v1003_v57  ;;  %1090 = vrot.lane.b32.xlu0 %v4600_v26, %s2178_s7  ;;  %v1368_v26 = vsel %vm1342_vm3, %v4616_v40, %v4615_v27  ;;  %v1370_v30 = vsel %vm1342_vm3, %v4624_v29, %v4623_v42  ;;  %v4625_v57 = vld [vmem:[#allocation165_spill] sm:$0xff] }
 0x21d   : > { %v1401_v50 = vsel %vm1375_vm4, %v1368_v26, %v4619_v34  ;;  %v1403_v15 = vsel %vm1375_vm4, %v1370_v30, %v4626_v22  ;;  %v4630_v26 = vld [vmem:[#allocation115_spill] sm:$0xff] }
 0x21e   : > { %v1007_v38 = vpop.permute.xlu0 %1006  ;;  %v1434_v21 = vsel %vm1408_vm5, %v1401_v50, %v4622_v39  ;;  %v4632_v50 = vld [vmem:[#allocation135_spill] sm:$0xff] }
 0x21f   : > { %v3628_v12 = vsel %vm1474_vm7, %v1466_v28, %v1007_v38  ;;  %v1467_v52 = vsel %vm1441_vm6, %v1434_v21, %v4625_v57  ;;  %v1436_v28 = vsel %vm1408_vm5, %v1403_v15, %v4628_v46  ;;  %v4629_v38 = vld [vmem:[#allocation60_spill] sm:$0xff]  ;;  %v4635_v39 = vld [vmem:[#allocation163_spill] sm:$0xff]  ;;  %v4638_v57 = vld [vmem:[#allocation101_spill] sm:$0xff] }
 0x220   : > { %1248 = vrot.lane.b32.xlu2 %v4618_v54, %s2180_s9  ;;  %v1349_v63 = vsel %vm1342_vm3, %v2313_v36, %v4629_v38  ;;  %v1469_v31 = vsel %vm1441_vm6, %v1436_v28, %v3330_v33  ;;  %v4631_v54 = vld [vmem:[#allocation108_spill] sm:$0xff]  ;;  %v4641_v38 = vld [vmem:[#allocation153_spill] sm:$0xff] }
 0x221   : > { %1106 = vrot.lane.b32.xlu1 %v4621_v3, %s2178_s7  ;;  %v1382_v35 = vsel %vm1375_vm4, %v1349_v63, %v4630_v26  ;;  %v1371_v34 = vsel %vm1342_vm3, %v2591_v45, %v4631_v54  ;;  %v4634_v36 = vld [vmem:[#allocation136_spill] sm:$0xff] }
 0x222   : > { %v1061_v6 = vpop.permute.xlu2 %1060  ;;  %v1415_v11 = vsel %vm1408_vm5, %v1382_v35, %v4632_v50  ;;  %v1404_v33 = vsel %vm1375_vm4, %v1371_v34, %v4634_v36  ;;  %v4644_v26 = vld [vmem:[#allocation172_spill] sm:$0xff]  ;;  %v2091_v34 = vunpack.i.h.bf16 %v4594_v20  ;;  %v4645_v50 = vld [vmem:[#allocation117_spill] sm:$0xff]  ;;  %v4646_v36 = vld [vmem:[#allocation111_spill] sm:$0xff] }
 0x223   : > { %v3653_v5 = vsel %vm1507_vm8, %v1478_v25, %v1061_v6  ;;  %v1009_v4 = vpop.permute.xlu1 %1008  ;;  %v1448_v21 = vsel %vm1441_vm6, %v1415_v11, %v4635_v39  ;;  %v4636_v25 = vld [vmem:[#allocation36_spill] sm:$0xff] }
 0x224   : > { %v3658_v55 = vsel %vm1474_vm7, %v1467_v52, %v1009_v4  ;;  %1264 = vrot.lane.b32.xlu0 %v4627_v53, %s2180_s9  ;;  %v4637_v6 = vld [vmem:[#allocation156_spill] sm:$0xff]  ;;  %v1481_v45 = vsel %vm1474_vm7, %v1448_v21, %v3389_v37  ;;  %v1373_v52 = vsel %vm1342_vm3, %v4621_v3, %v4638_v57  ;;  %v4639_v53 = vld [vmem:[#allocation137_spill] sm:$0xff] }
 0x225   : > { %v1437_v42 = vsel %vm1408_vm5, %v1404_v33, %v4637_v6  ;;  %v1406_v46 = vsel %vm1375_vm4, %v1373_v52, %v4639_v53  ;;  %v4640_v37 = vld [vmem:[#allocation85_spill] sm:$0xff]  ;;  %v4642_v3 = vld [vmem:[#allocation64_spill] sm:$0xff]  ;;  %v4647_v33 = vld [vmem:[#allocation46_spill] sm:$0xff] }
 0x226   : > { %v1013_v27 = vpop.permute.xlu0 %1012  ;;  %v1470_v4 = vsel %vm1441_vm6, %v1437_v42, %v3288_v60  ;;  %v1439_v63 = vsel %vm1408_vm5, %v1406_v46, %v4641_v38  ;;  %v1374_v39 = vsel %vm1342_vm3, %v4647_v33, %v4646_v36  ;;  %v4648_v21 = vld [vmem:[#allocation21_spill] sm:$0xff]  ;;  %v4650_v6 = vld [vmem:[#allocation138_spill] sm:$0xff]  ;;  %v4651_v20 = vld [vmem:[#allocation80_spill] sm:$0xff] }
 0x227   : > { %v3672_v16 = vsel %vm1474_vm7, %v1469_v31, %v1013_v27  ;;  %v4643_v31 = vld [vmem:[#allocation16_spill] sm:$0xff]  ;;  %v2086_v27 = vunpack.i.h.bf16 %v4591_v8  ;;  %v1472_v35 = vsel %vm1441_vm6, %v1439_v63, %v4644_v26  ;;  %v4649_v8 = vld [vmem:[#allocation14_spill] sm:$0xff]  ;;  %v1407_v42 = vsel %vm1375_vm4, %v1374_v39, %v4650_v6  ;;  %v4653_v57 = vld [vmem:[#allocation5_spill] sm:$0xff] }
 0x228   : > { %1202 = vrot.lane.b32.xlu2 %v4633_v10, %s2179_s8  ;;  %v1352_v60 = vsel %vm1342_vm3, %v4643_v31, %v4642_v3  ;;  %v4655_v38 = vld [vmem:[#allocation168_spill] sm:$0xff]  ;;  %v4660_v36 = vld [vmem:[#allocation11_spill] sm:$0xff] }
 0x229   : > { %1186 = vrot.lane.b32.xlu1 %v4636_v25, %s2179_s8  ;;  %v1385_v11 = vsel %vm1375_vm4, %v1352_v60, %v4645_v50  ;;  %v1344_v52 = vsel %vm1342_vm3, %v4653_v57, %v2086_v27  ;;  %v4656_v60 = vld [vmem:[#allocation139_spill] sm:$0xff]  ;;  %v4662_v6 = vld [vmem:[#allocation140_spill] sm:$0xff] }
 0x22a   : > { %v1067_v30 = vpop.permute.xlu2 %1066  ;;  %v1418_v25 = vsel %vm1408_vm5, %v1385_v11, %v4648_v21  ;;  %v4659_v11 = vld [vmem:[#allocation72_spill] sm:$0xff] }
 0x22b   : > { %v3697_v22 = vsel %vm1507_vm8, %v1481_v45, %v1067_v30  ;;  %v1015_v15 = vpop.permute.xlu1 %1014  ;;  %v1451_v45 = vsel %vm1441_vm6, %v1418_v25, %v4651_v20  ;;  %v4652_v30 = vld [vmem:[#allocation97_spill] sm:$0xff]  ;;  %v1345_v39 = vsel %vm1342_vm3, %v4660_v36, %v4659_v11  ;;  %v4661_v25 = vld [vmem:[#allocation103_spill] sm:$0xff]  ;;  %v4672_v11 = vld [vmem:[#allocation8_spill] sm:$0xff] }
 0x22c   : > { %v3702_v28 = vsel %vm1474_vm7, %v1470_v4, %v1015_v15  ;;  %1282 = vrot.lane.b32.xlu0 %v4640_v37, %s2180_s9  ;;  %v4654_v4 = vld [vmem:[#allocation159_spill] sm:$0xff]  ;;  %v1484_v53 = vsel %vm1474_vm7, %v1451_v45, %v3411_v32  ;;  %v1377_v37 = vsel %vm1375_vm4, %v1344_v52, %v2091_v34  ;;  %v4658_v32 = vld [vmem:[#allocation53_spill] sm:$0xff] }
 0x22d   : > { %v1440_v15 = vsel %vm1408_vm5, %v1407_v42, %v4654_v4  ;;  %v1410_v26 = vsel %vm1408_vm5, %v1377_v37, %v4656_v60  ;;  %v4664_v20 = vld [vmem:[#allocation9_spill] sm:$0xff] }
 0x22e   : > { %v1019_v54 = vpop.permute.xlu0 %1018  ;;  %v1473_v63 = vsel %vm1441_vm6, %v1440_v15, %v4655_v38  ;;  %v4666_v15 = vld [vmem:[#allocation114_spill] sm:$0xff] }
 0x22f   : > { %v3718_v10 = vsel %vm1474_vm7, %v1472_v35, %v1019_v54  ;;  %v4657_v35 = vld [vmem:[#allocation25_spill] sm:$0xff]  ;;  %v1443_v54 = vsel %vm1441_vm6, %v1410_v26, %v4658_v32  ;;  %v4669_v26 = vld [vmem:[#allocation55_spill] sm:$0xff] }
 0x230   : > { %1154 = vrot.lane.b32.xlu2 %v4649_v8, %s2179_s8  ;;  %v1476_v34 = vsel %vm1474_vm7, %v1443_v54, %v3363_v62  ;;  %v1378_v8 = vsel %vm1375_vm4, %v1345_v39, %v4661_v25  ;;  %v4663_v62 = vld [vmem:[#allocation76_spill] sm:$0xff]  ;;  %v1608_v25 = vld [vmem:[%s4218_s1 + $0x10] sm:$0xff] }
 0x231   : > { %1298 = vrot.lane.b32.xlu1 %v4652_v30, %s2180_s9  ;;  %v1411_v42 = vsel %vm1408_vm5, %v1378_v8, %v4662_v6  ;;  %v1347_v45 = vsel %vm1342_vm3, %v4664_v20, %v4663_v62  ;;  %v4665_v30 = vld [vmem:[#allocation160_spill] sm:$0xff]  ;;  %v4673_v8 = vld [vmem:[#allocation106_spill] sm:$0xff]  ;;  %v4676_v20 = vld [vmem:[#allocation65_spill] sm:$0xff] }
 0x232   : > { %v1073_v46 = vpop.permute.xlu2 %1072  ;;  %v1444_v52 = vsel %vm1441_vm6, %v1411_v42, %v4665_v30  ;;  %v4675_v42 = vld [vmem:[#allocation143_spill] sm:$0xff]  ;;  %v4677_v30 = vld [vmem:[#allocation78_spill] sm:$0xff] }
 0x233   : > { %v3743_v3 = vsel %vm1507_vm8, %v1484_v53, %v1073_v46  ;;  %v1021_v31 = vpop.permute.xlu1 %1020  ;;  %v1380_v53 = vsel %vm1375_vm4, %v1347_v45, %v4666_v15  ;;  %v4667_v46 = vld [vmem:[#allocation169_spill] sm:$0xff]  ;;  %v1607_v45 = vld [vmem:[%s4218_s1 + $0x8] sm:$0xff] }
 0x234   : > { %v3748_v27 = vsel %vm1474_vm7, %v1473_v63, %v1021_v31  ;;  %1170 = vrot.lane.b32.xlu0 %v4657_v35, %s2179_s8  ;;  %v4668_v63 = vld [vmem:[#allocation141_spill] sm:$0xff]  ;;  %v4670_v35 = vld [vmem:[#allocation155_spill] sm:$0xff]  ;;  %v4679_v15 = vld [vmem:[#allocation162_spill] sm:$0xff] }
 0x235   : > { %v1413_v31 = vsel %vm1408_vm5, %v1380_v53, %v4668_v63 }
 0x236   : > { %v1057_v50 = vpop.permute.xlu0 %1056  ;;  %v1446_v32 = vsel %vm1441_vm6, %v1413_v31, %v4670_v35  ;;  %v1606_v35 = vld [vmem:[%s4218_s1] sm:$0xff] }
 0x237   : > { %v3760_v21 = vsel %vm1507_vm8, %v1476_v34, %v1057_v50  ;;  %v1479_v54 = vsel %vm1474_vm7, %v1446_v32, %v3385_v43  ;;  %v4671_v50 = vld [vmem:[#allocation56_spill] sm:$0xff]  ;;  %v4674_v43 = vld [vmem:[#allocation39_spill] sm:$0xff] }
 0x238   : > { %1108 = vrot.lane.b32.xlu2 %v4647_v33, %s2178_s7  ;;  %v1477_v33 = vsel %vm1474_vm7, %v1444_v52, %v4667_v46  ;;  %v1348_v36 = vsel %vm1342_vm3, %v4672_v11, %v4671_v50  ;;  %v4678_v52 = vld [vmem:[#allocation12_spill] sm:$0xff]  ;;  %v4683_v50 = vld [vmem:[#allocation51_spill] sm:$0xff]  ;;  %v4684_v11 = vld [vmem:[#allocation157_spill] sm:$0xff] }
 0x239   : > { %1092 = vrot.lane.b32.xlu1 %v4566_v13, %s2178_s7  ;;  %v1610_v13 = vld [vmem:[%s4218_s1 + $0x20] sm:$0xf]  ;;  %v1381_v6 = vsel %vm1375_vm4, %v1348_v36, %v4673_v8  ;;  %v4682_v32 = vld [vmem:[#allocation144_spill] sm:$0xff] }
 0x23a   : > { %v1079_v4 = vpop.permute.xlu2 %1078  ;;  %2018 = vmatpush.msk.msra.mxu1 %vm1712_vm9, %v1610_v13  ;;  %2019 = vmatpush.msk.msra.mxu2 %vm1712_vm9, %v1610_v13  ;;  %v1414_v62 = vsel %vm1408_vm5, %v1381_v6, %v4675_v42  ;;  %v4685_v6 = vld [vmem:[#allocation100_spill] sm:$0xff] }
 0x23b   : > { %v3781_v37 = vsel %vm1507_vm8, %v3456_v0, %v1079_v4  ;;  %v1059_v38 = vpop.permute.xlu1 %1058  ;;  %v1609_v0 = vld [vmem:[%s4218_s1 + $0x18] sm:$0xff]  ;;  %2020 = vmatpush.msk.msra.mxu3 %vm1712_vm9, %v1610_v13  ;;  %1978 = vmatpush.msk.msra.mxu0 %vm1712_vm9, %v1610_v13  ;;  %v1350_v4 = vsel %vm1342_vm3, %v4678_v52, %v4677_v30  ;;  %v1447_v53 = vsel %vm1441_vm6, %v1414_v62, %v4679_v15  ;;  %v4681_v13 = vld [vmem:[#allocation170_spill] sm:$0xff]  ;;  %v4689_v15 = vld [vmem:[#allocation123_spill] sm:$0xff] }
 0x23c   : > { %v3789_v60 = vsel %vm1507_vm8, %v1477_v33, %v1059_v38  ;;  %1250 = vrot.lane.b32.xlu0 %v4669_v26, %s2180_s9  ;;  %2021 = vmatpush.msra.mxu1 %v1609_v0  ;;  %v4680_v33 = vld [vmem:[#allocation116_spill] sm:$0xff]  ;;  %v1480_v63 = vsel %vm1474_vm7, %v1447_v53, %v4681_v13  ;;  %v4692_v13 = vld [vmem:[#allocation82_spill] sm:$0xff] }
 0x23d   : > { %2022 = vmatpush.msra.mxu2 %v1609_v0  ;;  %2023 = vmatpush.msra.mxu3 %v1609_v0  ;;  %v1383_v38 = vsel %vm1375_vm4, %v1350_v4, %v4680_v33  ;;  %v4688_v30 = vld [vmem:[#allocation24_spill] sm:$0xff] }
 0x23e   : > { %v1063_v34 = vpop.permute.xlu0 %1062  ;;  %2024 = vmatpush.msra.mxu1 %v1608_v25  ;;  %1728 = vmatpush.msra.mxu0 %v1609_v0 }
 0x23f   : > { %v3804_v39 = vsel %vm1507_vm8, %v1479_v54, %v1063_v34  ;;  %2025 = vmatpush.msra.mxu2 %v1608_v25  ;;  %2026 = vmatpush.msra.mxu3 %v1608_v25  ;;  %v1416_v54 = vsel %vm1408_vm5, %v1383_v38, %v4682_v32 }
 0x240   : > { %1188 = vrot.lane.b32.xlu2 %v4674_v43, %s2179_s8  ;;  %2027 = vmatpush.msra.mxu1 %v1607_v45  ;;  %v4686_v43 = vld [vmem:[#allocation83_spill] sm:$0xff] }
 0x241   : > { %1266 = vrot.lane.b32.xlu1 %v4676_v20, %s2180_s9  ;;  %2028 = vmatpush.msra.mxu2 %v1607_v45  ;;  %v4687_v20 = vld [vmem:[#allocation17_spill] sm:$0xff] }
 0x242   : > { %v1085_v46 = vpop.permute.xlu2 %1084  ;;  %2030 = vmatpush.msra.mxu1 %v1606_v35  ;;  %2029 = vmatpush.msra.mxu3 %v1607_v45 }
 0x243   : > { %v3831_v31 = vsel %vm1507_vm8, %v3498_v14, %v1085_v46  ;;  %v1065_v26 = vpop.permute.xlu1 %1064  ;;  %v1449_v14 = vsel %vm1441_vm6, %v1416_v54, %v4684_v11  ;;  %2031 = vmatpush.msra.mxu2 %v1606_v35  ;;  %1729 = vmatpush.msra.mxu0 %v1608_v25  ;;  %v4690_v46 = vld [vmem:[#allocation68_spill] sm:$0xff]  ;;  %v4696_v54 = vld [vmem:[#allocation145_spill] sm:$0xff] }
 0x244   : > { %v3839_v34 = vsel %vm1507_vm8, %v1480_v63, %v1065_v26  ;;  %1204 = vrot.lane.b32.xlu0 %v4683_v50, %s2179_s8  ;;  %v1482_v36 = vsel %vm1474_vm7, %v1449_v14, %v3407_v56  ;;  %2032 = vmatpush.msra.mxu3 %v1606_v35  ;;  %v4693_v63 = vld [vmem:[#allocation15_spill] sm:$0xff]  ;;  %v4697_v14 = vld [vmem:[#allocation77_spill] sm:$0xff] }
 0x245   : > { %1730 = vmatpush.msra.mxu0 %v1607_v45 }
 0x246   : > { %v1069_v8 = vpop.permute.xlu0 %1068 }
 0x247   : > { %v3848_v0 = vsel %vm1507_vm8, %v1482_v36, %v1069_v8  ;;  %1731 = vmatpush.msra.mxu0 %v1606_v35  ;;  %v4694_v35 = vld [vmem:[#allocation38_spill] sm:$0xff]  ;;  %v4698_v8 = vld [vmem:[#allocation171_spill] sm:$0xff] }
 0x248   : > { %1300 = vrot.lane.b32.xlu2 %v4685_v6, %s2180_s9 }
 0x249   : > { %1284 = vrot.lane.b32.xlu1 %v4686_v43, %s2180_s9 }
 0x24a   : > { %v1103_v42 = vpop.permute.xlu2 %1102 }
 0x24b   : > { %v1071_v62 = vpop.permute.xlu1 %1070 }
 0x24c   : > { %1156 = vrot.lane.b32.xlu0 %v4687_v20, %s2179_s8  ;;  %v4700_v20 = vld [vmem:[#allocation152_spill] sm:$0xff] }
 0x24e   : > { %v1075_v56 = vpop.permute.xlu0 %1074 }
 0x24f   : > { %v3858_v25 = vsel %vm1507_vm8, %v3444_v41, %v1075_v56 }
 0x250   : > { %1094 = vrot.lane.b32.xlu2 %v4608_v2, %s2178_s7  ;;  %v4691_v2 = vld [vmem:[#allocation58_spill] sm:$0xff] }
 0x251   : > { %1172 = vrot.lane.b32.xlu1 %v4688_v30, %s2179_s8 }
 0x252   : > { %v1279_v45 = vpop.permute.xlu2 %1278 }
 0x253   : > { %v1077_v52 = vpop.permute.xlu1 %1076 }
 0x254   : > { %v3866_v4 = vsel %vm1507_vm8, %v3361_v24, %v1077_v52  ;;  %1110 = vrot.lane.b32.xlu0 %v4689_v15, %s2178_s7  ;;  %v1351_v24 = vsel %vm1342_vm3, %v4693_v63, %v4692_v13  ;;  %v4703_v13 = vld [vmem:[#allocation19_spill] sm:$0xff] }
 0x256   : > { %v1081_v53 = vpop.permute.xlu0 %1080 }
 0x257   : > { %v3872_v41 = vsel %vm1507_vm8, %v3486_v23, %v1081_v53  ;;  %v4695_v23 = vld [vmem:[#allocation109_spill] sm:$0xff]  ;;  %v4701_v53 = vld [vmem:[#allocation166_spill] sm:$0xff] }
 0x258   : > { %1268 = vrot.lane.b32.xlu2 %v4690_v46, %s2180_s9  ;;  %v1384_v32 = vsel %vm1375_vm4, %v1351_v24, %v4695_v23 }
 0x259   : > { %1252 = vrot.lane.b32.xlu1 %v4691_v2, %s2180_s9  ;;  %v1417_v50 = vsel %vm1408_vm5, %v1384_v32, %v4696_v54  ;;  %v4705_v54 = vld [vmem:[#allocation125_spill] sm:$0xff] }
 0x25a   : > { %v1167_v33 = vpop.permute.xlu2 %1166  ;;  %v1450_v36 = vsel %vm1441_vm6, %v1417_v50, %v4697_v14 }
 0x25b   : > { %v1083_v38 = vpop.permute.xlu1 %1082  ;;  %v1483_v6 = vsel %vm1474_vm7, %v1450_v36, %v4698_v8 }
 0x25c   : > { %v3883_v26 = vsel %vm1507_vm8, %v3383_v17, %v1083_v38  ;;  %1190 = vrot.lane.b32.xlu0 %v4694_v35, %s2179_s8  ;;  %v4699_v17 = vld [vmem:[#allocation86_spill] sm:$0xff]  ;;  %v1516_v43 = vsel %vm1507_vm8, %v1483_v6, %v1071_v62 }
 0x25d   : > { %v1549_v56 = vsel %vm1540_vm10, %v1516_v43, %v1167_v33  ;;  %v4702_v38 = vld [vmem:[#allocation26_spill] sm:$0xff] }
 0x25e   : > { %v1087_v11 = vpop.permute.xlu0 %1086 }
 0x25f   : > { %v1524_v46 = vsel %vm1507_vm8, %v3528_v61, %v1087_v11  ;;  %v1532_v61 = vsel %vm1507_vm8, %v3628_v12, %v1103_v42  ;;  %v4707_v12 = vld [vmem:[#allocation150_spill] sm:$0xff] }
 0x260   : > { %1286 = vrot.lane.b32.xlu2 %v4699_v17, %s2180_s9  ;;  %v4708_v42 = vld [vmem:[#allocation42_spill] sm:$0xff]  ;;  %v4709_v17 = vld [vmem:[#allocation91_spill] sm:$0xff] }
 0x261   : > { %1206 = vrot.lane.b32.xlu1 %v4700_v20, %s2179_s8 }
 0x262   : > { %v1263_v30 = vpop.permute.xlu2 %1262 }
 0x263   : > { %v1089_v52 = vpop.permute.xlu1 %1088  ;;  %v1582_v15 = vsel %vm1573_vm11, %v1549_v56, %v1263_v30 }
 0x264   : > { %1302 = vrot.lane.b32.xlu0 %v4701_v53, %s2180_s9  ;;  %1987 = vmatmul.msk.f32.vlgmr.msra.gmra.mxu1 %vm1615_vm12, %v1582_v15  ;;  %v1525_v20 = vsel %vm1507_vm8, %v3405_v51, %v1089_v52  ;;  %v4710_v15 = vld [vmem:[#allocation18_spill] sm:$0xff]  ;;  %v2092_v51 = vpack.i.bf16 %v4653_v57, %v4598_v1  ;;  %v4713_v57 = vld [vmem:[#allocation59_spill] sm:$0xff] }
 0x266   : > { %v1183_v2 = vpop.permute.xlu0 %1182 }
 0x267   : > { %v1557_v62 = vsel %vm1540_vm10, %v1524_v46, %v1183_v2 }
 0x268   : > { %1174 = vrot.lane.b32.xlu2 %v4702_v38, %s2179_s8  ;;  %v1590_v33 = vsel %vm1573_vm11, %v1557_v62, %v1279_v45  ;;  %v4704_v45 = vld [vmem:[#allocation57_spill] sm:$0xff]  ;;  %v4712_v62 = vld [vmem:[#allocation28_spill] sm:$0xff] }
 0x269   : > { %1158 = vrot.lane.b32.xlu1 %v4703_v13, %s2179_s8  ;;  %1995 = vmatmul.msk.f32.vlgmr.msra.gmra.mxu2 %vm1615_vm12, %v1590_v33 }
 0x26a   : > { %v1281_v63 = vpop.permute.xlu2 %1280 }
 0x26b   : > { %v1199_v24 = vpop.permute.xlu1 %1198 }
 0x26c   : > { %1096 = vrot.lane.b32.xlu0 %v4616_v40, %s2178_s7  ;;  %v1565_v35 = vsel %vm1540_vm10, %v1532_v61, %v1199_v24  ;;  %v4706_v40 = vld [vmem:[#allocation73_spill] sm:$0xff] }
 0x26e   : > { %v1295_v23 = vpop.permute.xlu0 %1294 }
 0x26f   : > { %v1598_v32 = vsel %vm1573_vm11, %v1565_v35, %v1295_v23  ;;  %v4714_v35 = vld [vmem:[#allocation45_spill] sm:$0xff]  ;;  %v4715_v23 = vld [vmem:[#allocation71_spill] sm:$0xff] }
 0x270   : > { %1254 = vrot.lane.b32.xlu2 %v4704_v45, %s2180_s9  ;;  %2003 = vmatmul.msk.f32.vlgmr.msra.gmra.mxu3 %vm1615_vm12, %v1598_v32  ;;  %v4716_v45 = vld [vmem:[#allocation7_spill] sm:$0xff] }
 0x271   : > { %1112 = vrot.lane.b32.xlu1 %v4705_v54, %s2178_s7 }
 0x272   : > { %v1169_v50 = vpop.permute.xlu2 %1168 }
 0x273   : > { %v1151_v11 = vpop.permute.xlu1 %1150 }
 0x274   : > { %1270 = vrot.lane.b32.xlu0 %v4706_v40, %s2180_s9  ;;  %v1541_v8 = vsel %vm1540_vm10, %v3609_v47, %v1151_v11  ;;  %v4711_v47 = vld [vmem:[#allocation167_spill] sm:$0xff]  ;;  %v4717_v40 = vld [vmem:[#allocation37_spill] sm:$0xff] }
 0x276   : > { %v1105_v14 = vpop.permute.xlu0 %1104 }
 0x277   : > { %v1533_v52 = vsel %vm1507_vm8, %v3658_v55, %v1105_v14  ;;  %v4718_v14 = vld [vmem:[#allocation89_spill] sm:$0xff] }
 0x278   : > { %1208 = vrot.lane.b32.xlu2 %v4707_v12, %s2179_s8 }
 0x279   : > { %1192 = vrot.lane.b32.xlu1 %v4708_v42, %s2179_s8 }
 0x27a   : > { %v1249_v36 = vpop.permute.xlu2 %1248 }
 0x27b   : > { %v1247_v6 = vpop.permute.xlu1 %1246 }
 0x27c   : > { %1288 = vrot.lane.b32.xlu0 %v4709_v17, %s2180_s9  ;;  %v1574_v43 = vsel %vm1573_vm11, %v1541_v8, %v1247_v6 }
 0x27d   : > { %1979 = vmatmul.msk.f32.vlgmr.msra.gmra.mxu0 %vm1615_vm12, %v1574_v43  ;;  %v4720_v43 = vld [vmem:[#allocation27_spill] sm:$0xff] }
 0x27e   : > { %v1185_v56 = vpop.permute.xlu0 %1184 }
 0x27f   : > { %v1558_v30 = vsel %vm1540_vm10, %v1525_v20, %v1185_v56 }
 0x280   : > { %1160 = vrot.lane.b32.xlu2 %v4710_v15, %s2179_s8  ;;  %v1591_v53 = vsel %vm1573_vm11, %v1558_v30, %v1281_v63  ;;  %v4721_v30 = vld [vmem:[#allocation62_spill] sm:$0xff] }
 0x281   : > { %1304 = vrot.lane.b32.xlu1 %v4711_v47, %s2180_s9  ;;  %1996 = vmatmul.msk.f32.gmra.mxu2 %vm1615_vm12, %v1591_v53  ;;  %v4722_v53 = vld [vmem:[#allocation44_spill] sm:$0xff] }
 0x282   : > { %v1203_v46 = vpop.permute.xlu2 %1202 }
 0x283   : > { %v1201_v2 = vpop.permute.xlu1 %1200 }
 0x284   : > { %1176 = vrot.lane.b32.xlu0 %v4712_v62, %s2179_s8  ;;  %v1566_v38 = vsel %vm1540_vm10, %v1533_v52, %v1201_v2  ;;  %v4724_v62 = vld [vmem:[#allocation92_spill] sm:$0xff] }
 0x286   : > { %v1297_v33 = vpop.permute.xlu0 %1296 }
 0x287   : > { %v1599_v13 = vsel %vm1573_vm11, %v1566_v38, %v1297_v33  ;;  %v4725_v38 = vld [vmem:[#allocation29_spill] sm:$0xff]  ;;  %v4726_v33 = vld [vmem:[#allocation22_spill] sm:$0xff] }
 0x288   : > { %2093 = vrot.lane.b32.xlu2 %v2092_v51, %s2178_s7  ;;  %2004 = vmatmul.msk.f32.gmra.mxu3 %vm1615_vm12, %v1599_v13 }
 0x289   : > { %1098 = vrot.lane.b32.xlu1 %v4576_v19, %s2178_s7 }
 0x28a   : > { %v1155_v63 = vpop.permute.xlu2 %1154 }
 0x28b   : > { %v1153_v24 = vpop.permute.xlu1 %1152 }
 0x28c   : > { %v1542_v1 = vsel %vm1540_vm10, %v3760_v21, %v1153_v24  ;;  %1256 = vrot.lane.b32.xlu0 %v4713_v57, %s2180_s9  ;;  %v1550_v21 = vsel %vm1540_vm10, %v3743_v3, %v1169_v50 }
 0x28d   : > { %v1575_v55 = vsel %vm1573_vm11, %v1542_v1, %v1249_v36  ;;  %v4719_v36 = vld [vmem:[#allocation20_spill] sm:$0xff]  ;;  %v4727_v1 = vld [vmem:[#allocation61_spill] sm:$0xff] }
 0x28e   : > { %1980 = vmatmul.msk.f32.gmra.mxu0 %vm1615_vm12, %v1575_v55  ;;  %v1091_v61 = vpop.permute.xlu0 %1090 }
 0x28f   : > { %v1526_v8 = vsel %vm1507_vm8, %v3540_v49, %v1091_v61 }
 0x290   : > { %1194 = vrot.lane.b32.xlu2 %v4714_v35, %s2179_s8 }
 0x291   : > { %1272 = vrot.lane.b32.xlu1 %v4715_v23, %s2180_s9  ;;  %v4728_v23 = vld [vmem:[#allocation79_spill] sm:$0xff] }
 0x292   : > { %v1109_v19 = vpop.permute.xlu2 %1108 }
 0x293   : > { %v1107_v32 = vpop.permute.xlu1 %1106  ;;  %v1535_v57 = vsel %vm1507_vm8, %v3672_v16, %v1109_v19 }
 0x294   : > { %2098 = vrot.lane.b32.xlu0 %v4716_v45, %s2179_s8  ;;  %v1534_v17 = vsel %vm1507_vm8, %v3523_v9, %v1107_v32 }
 0x295   : > { %v1567_v49 = vsel %vm1540_vm10, %v1534_v17, %v1203_v46  ;;  %v1543_v46 = vsel %vm1540_vm10, %v3789_v60, %v1155_v63 }
 0x296   : > { %v1265_v54 = vpop.permute.xlu0 %1264 }
 0x297   : > { %v1583_v11 = vsel %vm1573_vm11, %v1550_v21, %v1265_v54 }
 0x298   : > { %2103 = vrot.lane.b32.xlu2 %v4717_v40, %s2180_s9  ;;  %1988 = vmatmul.msk.f32.gmra.mxu1 %vm1615_vm12, %v1583_v11 }
 0x299   : > { %1290 = vrot.lane.b32.xlu1 %v4718_v14, %s2180_s9 }
 0x29a   : > { %v1189_v12 = vpop.permute.xlu2 %1188 }
 0x29b   : > { %v1187_v42 = vpop.permute.xlu1 %1186 }
 0x29c   : > { %1162 = vrot.lane.b32.xlu0 %v4719_v36, %s2179_s8  ;;  %v1559_v3 = vsel %vm1540_vm10, %v1526_v8, %v1187_v42 }
 0x29e   : > { %v1283_v50 = vpop.permute.xlu0 %1282 }
 0x29f   : > { %v1592_v6 = vsel %vm1573_vm11, %v1559_v3, %v1283_v50 }
 0x2a0   : > { %1100 = vrot.lane.b32.xlu2 %v4624_v29, %s2178_s7  ;;  %1997 = vmatmul.msk.f32.gmra.mxu2 %vm1615_vm12, %v1592_v6  ;;  %v4723_v29 = vld [vmem:[#allocation74_spill] sm:$0xff]  ;;  %s4061_s7 = scalar_lea.vmem [#allocation2], %s1975_s6 }
 0x2a1   : > { %1178 = vrot.lane.b32.xlu1 %v4720_v43, %s2179_s8  ;;  %s1906_s17 = sshll.u32 %s4061_s7, 4  ;;  %s1907_s17 = int_to_ptr.vmem [resolvable:$true] %s1906_s17 }
 0x2a2   : > { %v1301_v20 = vpop.permute.xlu2 %1300 }
 0x2a3   : > { %v1299_v56 = vpop.permute.xlu1 %1298 }
 0x2a4   : > { %1258 = vrot.lane.b32.xlu0 %v4721_v30, %s2180_s9  ;;  %v1600_v15 = vsel %vm1573_vm11, %v1567_v49, %v1299_v56 }
 0x2a5   : > { %2005 = vmatmul.msk.f32.gmra.mxu3 %vm1615_vm12, %v1600_v15 }
 0x2a6   : > { %v1171_v9 = vpop.permute.xlu0 %1170 }
 0x2a7   : > { %v1551_v13 = vsel %vm1540_vm10, %v3858_v25, %v1171_v9 }
 0x2a8   : > { %1196 = vrot.lane.b32.xlu2 %v4722_v53, %s2179_s8 }
 0x2a9   : > { %1274 = vrot.lane.b32.xlu1 %v4723_v29, %s2180_s9 }
 0x2aa   : > { %v1095_v47 = vpop.permute.xlu2 %1094 }
 0x2ab   : > { %v1093_v2 = vpop.permute.xlu1 %1092  ;;  %v1528_v8 = vsel %vm1507_vm8, %v3439_v48, %v1095_v47 }
 0x2ac   : > { %1292 = vrot.lane.b32.xlu0 %v4724_v62, %s2180_s9  ;;  %v1527_v35 = vsel %vm1507_vm8, %v3572_v18, %v1093_v2 }
 0x2ad   : > { %v1560_v45 = vsel %vm1540_vm10, %v1527_v35, %v1189_v12 }
 0x2ae   : > { %v1251_v51 = vpop.permute.xlu0 %1250 }
 0x2af   : > { %v1576_v52 = vsel %vm1573_vm11, %v1543_v46, %v1251_v51 }
 0x2b0   : > { %1180 = vrot.lane.b32.xlu2 %v4725_v38, %s2179_s8  ;;  %1981 = vmatmul.msk.f32.gmra.mxu0 %vm1615_vm12, %v1576_v52 }
 0x2b1   : > { %1164 = vrot.lane.b32.xlu1 %v4726_v33, %s2179_s8  ;;  %s2017_s8 = sshll.u32 %s2223_s16, 8  ;;  %s1894_s16 = scalar_lea.sflag [#allocation3], %s161_s29 }
 0x2b2   : > { %v1269_v63 = vpop.permute.xlu2 %1268  ;;  %s1905_s11 = scalar_lea.hbm %s4220_s3, %s2017_s8 }
 0x2b3   : > { %v1267_v24 = vpop.permute.xlu1 %1266  ;;  %s1908_s19 = sshll.u32 %s1905_s11, 4  ;;  %s1909_s19 = int_to_ptr.hbm [resolvable:$true] %s1908_s19 }
 0x2b4   : > { %1260 = vrot.lane.b32.xlu0 %v4727_v1, %s2180_s9  ;;  %v1584_v60 = vsel %vm1573_vm11, %v1551_v13, %v1267_v24  ;;  %s2122_s20 = sshra.s32 %s1909_s19, 4  ;;  %s2123_s20 = int_to_ptr.hbm [resolvable:$true] %s2122_s20 }
 0x2b5   : > { %1989 = vmatmul.msk.f32.gmra.mxu1 %vm1615_vm12, %v1584_v60  ;;  %s2124_s24 = scalar_lea.hbm %s2123_s20, 256  ;;  %p2129_p0 = scmp.lt.s32.totalorder %s2123_s20, %s4220_s3 }
 0x2b6   : > { %v1205_v55 = vpop.permute.xlu0 %1204  ;;  %p2125_p11 = scmp.ne.s32.totalorder %s2123_s20, %s2124_s24  ;;  %p2130_p1 = scmp.lt.s32.totalorder %s2128_s27, %s2124_s24 }
 0x2b7   : > { %v1568_v61 = vsel %vm1540_vm10, %v1535_v57, %v1205_v55 }
 0x2b8   : > { %v1601_v25 = vsel %vm1573_vm11, %v1568_v61, %v1301_v20  ;;  %p2126_p12 = pnand %p2125_p11, %p2240_p5  ;;  %p2131_p2 = por %p2130_p1, %p2129_p0 }
 0x2b9   : > { %1276 = vrot.lane.b32.xlu1 %v4728_v23, %s2180_s9  ;;  %2006 = vmatmul.msk.f32.gmra.mxu3 %vm1615_vm12, %v1601_v25 }
 0x2ba   : > { %v1287_v19 = vpop.permute.xlu2 %1286  ;;  %p2127_p13 = pneg %p2126_p12 }
 0x2bb   : > { %v1285_v32 = vpop.permute.xlu1 %1284 }
 0x2bc   : > { %v1593_v21 = vsel %vm1573_vm11, %v1560_v45, %v1285_v32  ;;  %p2132_p3 = pnand %p2131_p2, %p2127_p13 }
 0x2bd   : > { %1998 = vmatmul.msk.f32.gmra.mxu2 %vm1615_vm12, %v1593_v21 }
 0x2be   : > { %v1157_v16 = vpop.permute.xlu0 %1156 }
 0x2bf   : > { %v1544_v42 = vsel %vm1540_vm10, %v3653_v5, %v1157_v16 }
 0x2c2   : > { %v1175_v14 = vpop.permute.xlu2 %1174 }
 0x2c3   : > { %v1173_v54 = vpop.permute.xlu1 %1172 }
 0x2c4   : > { %v1552_v18 = vsel %vm1540_vm10, %v3866_v4, %v1173_v54 }
 0x2c5   : > { %v1585_v11 = vsel %vm1573_vm11, %v1552_v18, %v1269_v63 }
 0x2c6   : > { %1990 = vmatmul.msk.f32.gmra.mxu1 %vm1615_vm12, %v1585_v11  ;;  %v1111_v40 = vpop.permute.xlu0 %1110 }
 0x2c7   : > { %v1536_v5 = vsel %vm1507_vm8, %v3702_v28, %v1111_v40  ;;  %v4054_v28 = vld [vmem:[%s4219_s2] ss:$0 sm:$0xff] }
 0x2ca   : > { %v1255_v6 = vpop.permute.xlu2 %1254 }
 0x2cb   : > { %v1253_v12 = vpop.permute.xlu1 %1252 }
 0x2cc   : > { %v1577_v36 = vsel %vm1573_vm11, %v1544_v42, %v1253_v12 }
 0x2cd   : > { %1982 = vmatmul.msk.f32.gmra.mxu0 %vm1615_vm12, %v1577_v36 }
 0x2ce   : > { %v1191_v3 = vpop.permute.xlu0 %1190 }
 0x2cf   : > { %v1561_v4 = vsel %vm1540_vm10, %v1528_v8, %v1191_v3 }
 0x2d0   : > { %v1594_v50 = vsel %vm1573_vm11, %v1561_v4, %v1287_v19 }
 0x2d1   : > { %1999 = vmatmul.msk.f32.gmra.mxu2 %vm1615_vm12, %v1594_v50 }
 0x2d2   : > { %v1209_v30 = vpop.permute.xlu2 %1208 }
 0x2d3   : > { %v1207_v17 = vpop.permute.xlu1 %1206 }
 0x2d4   : > { %v1569_v43 = vsel %vm1540_vm10, %v1536_v5, %v1207_v17 }
 0x2d6   : > { %v1303_v20 = vpop.permute.xlu0 %1302 }
 0x2d7   : > { %v1602_v56 = vsel %vm1573_vm11, %v1569_v43, %v1303_v20 }
 0x2d8   : > { %2007 = vmatmul.msk.f32.gmra.mxu3 %vm1615_vm12, %v1602_v56 }
 0x2da   : > { %v1161_v46 = vpop.permute.xlu2 %1160 }
 0x2db   : > { %v1159_v48 = vpop.permute.xlu1 %1158  ;;  %v1546_v54 = vsel %vm1540_vm10, %v3839_v34, %v1161_v46 }
 0x2dc   : > { %v1545_v49 = vsel %vm1540_vm10, %v3804_v39, %v1159_v48  ;;  %v1553_v39 = vsel %vm1540_vm10, %v3781_v37, %v1175_v14 }
 0x2dd   : > { %v1578_v15 = vsel %vm1573_vm11, %v1545_v49, %v1255_v6 }
 0x2de   : > { %1983 = vmatmul.msk.f32.gmra.mxu0 %vm1615_vm12, %v1578_v15  ;;  %v1097_v9 = vpop.permute.xlu0 %1096 }
 0x2df   : > { %v1529_v33 = vsel %vm1507_vm8, %v3584_v7, %v1097_v9 }
 0x2e1   : > { %v1757_v53 = vpop.f32.mrf.mxu1 }
 0x2e2   : > { %v1758_v29 = vadd.f32 %v4054_v28, %v1757_v53  ;;  %v2094_v57 = vpop.permute.xlu2 %2093 }
 0x2e3   : > { %v1113_v47 = vpop.permute.xlu1 %1112  ;;  %v2095_v42 = vunpack.i.l.bf16 %v2094_v57  ;;  %v2096_v43 = vunpack.i.h.bf16 %v2094_v57 }
 0x2e4   : > { %v1837_v2 = vmax.f32 %v1758_v29, 0.0  ;;  %v1537_v63 = vsel %vm1507_vm8, %v3567_v44, %v1113_v47 }
 0x2e5   : > { %v1570_v7 = vsel %vm1540_vm10, %v1537_v63, %v1209_v30 }
 0x2e6   : > { %1869 = vst [vmem:[%s4061_s7 + $0x40] sm:$0xff] %v1837_v2  ;;  %v1271_v62 = vpop.permute.xlu0 %1270  ;;  %v1539_v2 = vsel %vm1507_vm8, %v3748_v27, %v2096_v43 }
 0x2e7   : > { %v1586_v51 = vsel %vm1573_vm11, %v1553_v39, %v1271_v62 }
 0x2e8   : > { %1991 = vmatmul.msk.f32.gmra.mxu1 %vm1615_vm12, %v1586_v51 }
 0x2ea   : > { %v1195_v44 = vpop.permute.xlu2 %1194 }
 0x2eb   : > { %v1193_v52 = vpop.permute.xlu1 %1192 }
 0x2ec   : > { %v1781_v38 = vpop.f32.mrf.mxu2  ;;  %v1562_v37 = vsel %vm1540_vm10, %v1529_v33, %v1193_v52 }
 0x2ed   : > { %v1782_v13 = vadd.f32 %v4054_v28, %v1781_v38 }
 0x2ee   : > { %v1289_v24 = vpop.permute.xlu0 %1288 }
 0x2ef   : > { %v1845_v1 = vmax.f32 %v1782_v13, 0.0  ;;  %v1595_v60 = vsel %vm1573_vm11, %v1562_v37, %v1289_v24 }
 0x2f0   : > { %2000 = vmatmul.msk.f32.gmra.mxu2 %vm1615_vm12, %v1595_v60 }
 0x2f1   : > { %1877 = vst [vmem:[%s4061_s7 + $0x80] sm:$0xff] %v1845_v1 }
 0x2f2   : > { %v2104_v8 = vpop.permute.xlu2 %2103 }
 0x2f3   : > { %v1305_v55 = vpop.permute.xlu1 %1304  ;;  %v1805_v61 = vpop.f32.mrf.mxu3  ;;  %v2105_v3 = vunpack.i.l.bf16 %v2104_v8  ;;  %v2106_v53 = vunpack.i.h.bf16 %v2104_v8 }
 0x2f4   : > { %v1806_v35 = vadd.f32 %v4054_v28, %v1805_v61  ;;  %v1603_v25 = vsel %vm1573_vm11, %v1570_v7, %v1305_v55 }
 0x2f5   : > { %2008 = vmatmul.msk.f32.gmra.mxu3 %vm1615_vm12, %v1603_v25 }
 0x2f6   : > { %v1853_v23 = vmax.f32 %v1806_v35, 0.0  ;;  %v1177_v32 = vpop.permute.xlu0 %1176 }
 0x2f7   : > { %v1554_v40 = vsel %vm1540_vm10, %v3872_v41, %v1177_v32  ;;  %v1538_v41 = vsel %vm1507_vm8, %v3718_v10, %v2095_v42 }
 0x2f8   : > { %1885 = vst [vmem:[%s4061_s7 + $0xc0] sm:$0xff] %v1853_v23 }
 0x2fa   : > { %v1733_v45 = vpop.f32.mrf.mxu0  ;;  %v1101_v46 = vpop.permute.xlu2 %1100 }
 0x2fb   : > { %v1734_v21 = vadd.f32 %v4054_v28, %v1733_v45  ;;  %v1099_v16 = vpop.permute.xlu1 %1098 }
 0x2fc   : > { %v1530_v17 = vsel %vm1507_vm8, %v3614_v58, %v1099_v16 }
 0x2fd   : > { %v1829_v19 = vmax.f32 %v1734_v21, 0.0  ;;  %v1563_v30 = vsel %vm1540_vm10, %v1530_v17, %v1195_v44 }
 0x2fe   : > { %v1257_v18 = vpop.permute.xlu0 %1256 }
 0x2ff   : > { %1861 = vst [vmem:[%s4061_s7] sm:$0xff] %v1829_v19  ;;  %v1579_v11 = vsel %vm1573_vm11, %v1546_v54, %v1257_v18 }
 0x300   : > { %1984 = vmatmul.msk.f32.gmra.mxu0 %vm1615_vm12, %v1579_v11 }
 0x302   : > { %v1197_v1 = vpop.permute.xlu2 %1196 }
 0x303   : > { %v1273_v14 = vpop.permute.xlu1 %1272 }
 0x304   : > { %v1587_v12 = vsel %vm1573_vm11, %v1554_v40, %v1273_v14  ;;  %v1784_v36 = vpop.f32.mrf.mxu2 }
 0x305   : > { %1992 = vmatmul.msk.f32.gmra.mxu1 %vm1615_vm12, %v1587_v12  ;;  %v1785_v34 = vadd.f32 %v4054_v28, %v1784_v36 }
 0x306   : > { %v2099_v4 = vpop.permute.xlu0 %2098 }
 0x307   : > { %v1846_v50 = vmax.f32 %v1785_v34, 0.0  ;;  %v2100_v6 = vunpack.i.l.bf16 %v2099_v4  ;;  %v2101_v56 = vunpack.i.h.bf16 %v2099_v4 }
 0x309   : > { %1878 = vst [vmem:[%s4061_s7 + $0x88] sm:$0xff] %v1846_v50  ;;  %v1571_v5 = vsel %vm1540_vm10, %v1538_v41, %v2100_v6  ;;  %v1572_v62 = vsel %vm1540_vm10, %v1539_v2, %v2101_v56 }
 0x30a   : > { %v1604_v20 = vsel %vm1573_vm11, %v1571_v5, %v2105_v3  ;;  %v1605_v51 = vsel %vm1573_vm11, %v1572_v62, %v2106_v53  ;;  %v1181_v44 = vpop.permute.xlu2 %1180 }
 0x30b   : > { %v1291_v48 = vpop.permute.xlu1 %1290  ;;  %v1736_v49 = vpop.f32.mrf.mxu0  ;;  %2009 = vmatmul.msk.f32.gmra.mxu3 %vm1615_vm12, %v1604_v20  ;;  %v1556_v19 = vsel %vm1540_vm10, %v3831_v31, %v1181_v44 }
 0x30c   : > { %v1737_v58 = vadd.f32 %v4054_v28, %v1736_v49  ;;  %v1808_v15 = vpop.f32.mrf.mxu3  ;;  %v1596_v10 = vsel %vm1573_vm11, %v1563_v30, %v1291_v48 }
 0x30d   : > { %v1809_v9 = vadd.f32 %v4054_v28, %v1808_v15  ;;  %2001 = vmatmul.msk.f32.gmra.mxu2 %vm1615_vm12, %v1596_v10 }
 0x30e   : > { %v1830_v29 = vmax.f32 %v1737_v58, 0.0  ;;  %v1163_v47 = vpop.permute.xlu0 %1162 }
 0x30f   : > { %v1854_v39 = vmax.f32 %v1809_v9, 0.0  ;;  %v1547_v33 = vsel %vm1540_vm10, %v3697_v22, %v1163_v47  ;;  %v1531_v22 = vsel %vm1507_vm8, %v3481_v59, %v1101_v46 }
 0x310   : > { %1862 = vst [vmem:[%s4061_s7 + $0x8] sm:$0xff] %v1830_v29  ;;  %v1564_v55 = vsel %vm1540_vm10, %v1531_v22, %v1197_v1 }
 0x311   : > { %1886 = vst [vmem:[%s4061_s7 + $0xc8] sm:$0xff] %v1854_v39 }
 0x313   : > { %v1179_v52 = vpop.permute.xlu1 %1178  ;;  %2010 = vmatmul.msk.f32.gmra.mxu3 %vm1615_vm12, %v1605_v51 }
 0x314   : > { %v1555_v60 = vsel %vm1540_vm10, %v3883_v26, %v1179_v52 }
 0x315   : > { %v1760_v38 = vpop.f32.mrf.mxu1 }
 0x316   : > { %v1761_v13 = vadd.f32 %v4054_v28, %v1760_v38  ;;  %v1259_v37 = vpop.permute.xlu0 %1258 }
 0x317   : > { %v1580_v27 = vsel %vm1573_vm11, %v1547_v33, %v1259_v37 }
 0x318   : > { %v1838_v24 = vmax.f32 %v1761_v13, 0.0  ;;  %1985 = vmatmul.msk.f32.gmra.mxu0 %vm1615_vm12, %v1580_v27 }
 0x31a   : > { %1870 = vst [vmem:[%s4061_s7 + $0x48] sm:$0xff] %v1838_v24 }
 0x31b   : > { %v1275_v63 = vpop.permute.xlu1 %1274 }
 0x31c   : > { %v1588_v57 = vsel %vm1573_vm11, %v1555_v60, %v1275_v63 }
 0x31d   : > { %1993 = vmatmul.msk.f32.gmra.mxu1 %vm1615_vm12, %v1588_v57 }
 0x31e   : > { %v1293_v61 = vpop.permute.xlu0 %1292 }
 0x31f   : > { %v1597_v7 = vsel %vm1573_vm11, %v1564_v55, %v1293_v61 }
 0x320   : > { %2002 = vmatmul.msk.f32.gmra.mxu2 %vm1615_vm12, %v1597_v7 }
 0x323   : > { %v1165_v35 = vpop.permute.xlu1 %1164  ;;  %v1787_v25 = vpop.f32.mrf.mxu2 }
 0x324   : > { %v1788_v26 = vadd.f32 %v4054_v28, %v1787_v25  ;;  %v1548_v23 = vsel %vm1540_vm10, %v3848_v0, %v1165_v35 }
 0x326   : > { %v1847_v32 = vmax.f32 %v1788_v26, 0.0  ;;  %v1261_v45 = vpop.permute.xlu0 %1260 }
 0x327   : > { %v1581_v59 = vsel %vm1573_vm11, %v1548_v23, %v1261_v45 }
 0x328   : > { %1879 = vst [vmem:[%s4061_s7 + $0x90] sm:$0xff] %v1847_v32  ;;  %v1811_v21 = vpop.f32.mrf.mxu3  ;;  %1986 = vmatmul.msk.f32.gmra.mxu0 %vm1615_vm12, %v1581_v59 }
 0x329   : > { %v1812_v16 = vadd.f32 %v4054_v28, %v1811_v21 }
 0x32b   : > { %v1855_v54 = vmax.f32 %v1812_v16, 0.0  ;;  %v1277_v18 = vpop.permute.xlu1 %1276 }
 0x32c   : > { %v1589_v0 = vsel %vm1573_vm11, %v1556_v19, %v1277_v18 }
 0x32d   : > { %1887 = vst [vmem:[%s4061_s7 + $0xd0] sm:$0xff] %v1855_v54  ;;  %1994 = vmatmul.msk.f32.gmra.mxu1 %vm1615_vm12, %v1589_v0  ;;  %v1739_v11 = vpop.f32.mrf.mxu0 }
 0x32e   : > { %v1740_v40 = vadd.f32 %v4054_v28, %v1739_v11 }
 0x330   : > { %v1831_v14 = vmax.f32 %v1740_v40, 0.0 }
 0x332   : > { %1863 = vst [vmem:[%s4061_s7 + $0x10] sm:$0xff] %v1831_v14  ;;  %v1763_v42 = vpop.f32.mrf.mxu1 }
 0x333   : > { %v1764_v12 = vadd.f32 %v4054_v28, %v1763_v42 }
 0x335   : > { %v1839_v36 = vmax.f32 %v1764_v12, 0.0 }
 0x337   : > { %1871 = vst [vmem:[%s4061_s7 + $0x50] sm:$0xff] %v1839_v36 }
 0x33c   : > { %v1814_v31 = vpop.f32.mrf.mxu3 }
 0x33d   : > { %v1815_v8 = vadd.f32 %v4054_v28, %v1814_v31 }
 0x33f   : > { %v1856_v34 = vmax.f32 %v1815_v8, 0.0 }
 0x340   : > { %v1790_v3 = vpop.f32.mrf.mxu2 }
 0x341   : > { %1888 = vst [vmem:[%s4061_s7 + $0xd8] sm:$0xff] %v1856_v34  ;;  %v1791_v4 = vadd.f32 %v4054_v28, %v1790_v3 }
 0x343   : > { %v1848_v50 = vmax.f32 %v1791_v4, 0.0  ;;  %v1766_v6 = vpop.f32.mrf.mxu1 }
 0x344   : > { %v1767_v17 = vadd.f32 %v4054_v28, %v1766_v6 }
 0x345   : > { %1880 = vst [vmem:[%s4061_s7 + $0x98] sm:$0xff] %v1848_v50 }
 0x346   : > { %v1840_v41 = vmax.f32 %v1767_v17, 0.0 }
 0x348   : > { %1872 = vst [vmem:[%s4061_s7 + $0x58] sm:$0xff] %v1840_v41 }
 0x34a   : > { %v1742_v5 = vpop.f32.mrf.mxu0 }
 0x34b   : > { %v1743_v43 = vadd.f32 %v4054_v28, %v1742_v5 }
 0x34d   : > { %v1832_v20 = vmax.f32 %v1743_v43, 0.0 }
 0x34f   : > { %1864 = vst [vmem:[%s4061_s7 + $0x18] sm:$0xff] %v1832_v20 }
 0x354   : > { %v1793_v56 = vpop.f32.mrf.mxu2 }
 0x355   : > { %v1794_v48 = vadd.f32 %v4054_v28, %v1793_v56 }
 0x357   : > { %v1849_v49 = vmax.f32 %v1794_v48, 0.0 }
 0x359   : > { %1881 = vst [vmem:[%s4061_s7 + $0xa0] sm:$0xff] %v1849_v49 }
 0x35b   : > { %v1745_v30 = vpop.f32.mrf.mxu0  ;;  %v1817_v58 = vpop.f32.mrf.mxu3 }
 0x35c   : > { %v1746_v15 = vadd.f32 %v4054_v28, %v1745_v30  ;;  %v1818_v10 = vadd.f32 %v4054_v28, %v1817_v58 }
 0x35e   : > { %v1833_v9 = vmax.f32 %v1746_v15, 0.0  ;;  %v1857_v53 = vmax.f32 %v1818_v10, 0.0 }
 0x360   : > { %1865 = vst [vmem:[%s4061_s7 + $0x20] sm:$0xff] %v1833_v9 }
 0x361   : > { %1889 = vst [vmem:[%s4061_s7 + $0xe0] sm:$0xff] %v1857_v53 }
 0x365   : > { %v1769_v29 = vpop.f32.mrf.mxu1 }
 0x366   : > { %v1770_v47 = vadd.f32 %v4054_v28, %v1769_v29 }
 0x368   : > { %v1841_v2 = vmax.f32 %v1770_v47, 0.0 }
 0x36a   : > { %1873 = vst [vmem:[%s4061_s7 + $0x60] sm:$0xff] %v1841_v2 }
 0x373   : > { %v1796_v39 = vpop.f32.mrf.mxu2 }
 0x374   : > { %v1797_v62 = vadd.f32 %v4054_v28, %v1796_v39 }
 0x376   : > { %v1850_v46 = vmax.f32 %v1797_v62, 0.0 }
 0x378   : > { %1882 = vst [vmem:[%s4061_s7 + $0xa8] sm:$0xff] %v1850_v46  ;;  %v1820_v51 = vpop.f32.mrf.mxu3 }
 0x379   : > { %v1821_v52 = vadd.f32 %v4054_v28, %v1820_v51 }
 0x37b   : > { %v1858_v38 = vmax.f32 %v1821_v52, 0.0 }
 0x37d   : > { %1890 = vst [vmem:[%s4061_s7 + $0xe8] sm:$0xff] %v1858_v38  ;;  %v1748_v33 = vpop.f32.mrf.mxu0 }
 0x37e   : > { %v1749_v13 = vadd.f32 %v4054_v28, %v1748_v33 }
 0x380   : > { %v1834_v37 = vmax.f32 %v1749_v13, 0.0 }
 0x382   : > { %1866 = vst [vmem:[%s4061_s7 + $0x28] sm:$0xff] %v1834_v37  ;;  %v1772_v27 = vpop.f32.mrf.mxu1 }
 0x383   : > { %v1773_v24 = vadd.f32 %v4054_v28, %v1772_v27 }
 0x385   : > { %v1842_v1 = vmax.f32 %v1773_v24, 0.0 }
 0x387   : > { %1874 = vst [vmem:[%s4061_s7 + $0x68] sm:$0xff] %v1842_v1 }
 0x38e   : > { %v1823_v60 = vpop.f32.mrf.mxu3 }
 0x38f   : > { %v1824_v63 = vadd.f32 %v4054_v28, %v1823_v60 }
 0x390   : > { %v1799_v57 = vpop.f32.mrf.mxu2 }
 0x391   : > { %v1859_v22 = vmax.f32 %v1824_v63, 0.0  ;;  %v1800_v55 = vadd.f32 %v4054_v28, %v1799_v57 }
 0x393   : > { %1891 = vst [vmem:[%s4061_s7 + $0xf0] sm:$0xff] %v1859_v22  ;;  %v1851_v61 = vmax.f32 %v1800_v55, 0.0 }
 0x395   : > { %1883 = vst [vmem:[%s4061_s7 + $0xb0] sm:$0xff] %v1851_v61  ;;  %v1751_v7 = vpop.f32.mrf.mxu0 }
 0x396   : > { %v1752_v35 = vadd.f32 %v4054_v28, %v1751_v7  ;;  %v1826_v25 = vpop.f32.mrf.mxu3 }
 0x397   : > { %v1827_v26 = vadd.f32 %v4054_v28, %v1826_v25 }
 0x398   : > { %v1835_v23 = vmax.f32 %v1752_v35, 0.0 }
 0x399   : > { %v1860_v32 = vmax.f32 %v1827_v26, 0.0 }
 0x39a   : > { %1867 = vst [vmem:[%s4061_s7 + $0x30] sm:$0xff] %v1835_v23  ;;  %v1775_v45 = vpop.f32.mrf.mxu1 }
 0x39b   : > { %1892 = vst [vmem:[%s4061_s7 + $0xf8] sm:$0xff] %v1860_v32  ;;  %v1776_v59 = vadd.f32 %v4054_v28, %v1775_v45 }
 0x39d   : > { %v1843_v44 = vmax.f32 %v1776_v59, 0.0 }
 0x39f   : > { %1875 = vst [vmem:[%s4061_s7 + $0x70] sm:$0xff] %v1843_v44 }
 0x3a3   : > { %v1802_v21 = vpop.f32.mrf.mxu2 }
 0x3a4   : > { %v1803_v16 = vadd.f32 %v4054_v28, %v1802_v21 }
 0x3a5   : > { %v1754_v19 = vpop.f32.mrf.mxu0 }
 0x3a6   : > { %v1852_v54 = vmax.f32 %v1803_v16, 0.0  ;;  %v1755_v18 = vadd.f32 %v4054_v28, %v1754_v19 }
 0x3a8   : > { %1884 = vst [vmem:[%s4061_s7 + $0xb8] sm:$0xff] %v1852_v54  ;;  %v1836_v0 = vmax.f32 %v1755_v18, 0.0 }
 0x3aa   : > { %1868 = vst [vmem:[%s4061_s7 + $0x38] sm:$0xff] %v1836_v0  ;;  %v1778_v11 = vpop.f32.mrf.mxu1 }
 0x3ab   : > { %v1779_v40 = vadd.f32 %v4054_v28, %v1778_v11 }
 0x3ad   : > { %v1844_v14 = vmax.f32 %v1779_v40, 0.0 }
 0x3af   : > { %1876 = vst [vmem:[%s4061_s7 + $0x78] sm:$0xff] %v1844_v14 }
 0x3b0   : > { %2135 = shalt.err (!%p2132_p3)
}
 0x3b1   : > { %s2181_s29 = smov 128  }
 0x3b2   : > { %2033 = dma.vmem_to_hbm [thread:$0]  (%p2240_p5), %s1907_s17, 4096, %s1909_s19, %s1894_s16, %s2181_s29, %s2181_s29, %s2174_s30  }
 0x3b3 PF: > { %p2039_p4 = scmp.ge.s32.totalorder %s2170_s15, 2  ;;  %s1923_s5 = sand.u32 1, %s2158_s12  }
 0x3b4   : > { %s1924_s6 = scalar_lea.sflag [#allocation3], %s1923_s5 }
 0x3b5   : > { %p2036_p7 = pnand %p2039_p4, %p2244_p6 }
 0x3b7   : > { %p2037_p8 = pneg %p2036_p7 }
 0x3b9   : > { %2153 = dma.done.wait (%p2037_p8), %s1924_s6, 4096  }
 0x3ba   : > { %2155 = vsyncadd (%p2037_p8), %s1924_s6, 4294963200  ;;  %p13_p9 = scmp.ge.s32.totalorder %s2227_s18, 4   ;;  %s4729_s12 = smov %s2162_s13 }
 0x3bb   : > { %s4730_s13 = smov %s2166_s14  ;;  %s4731_s14 = smov %s2238_s21 }
 0x3bc   : > { %s4732_s15 = smov %s2227_s18  ;;  %15 = sbr.rel (!%p13_p9) target bundleno = 3 (0x3), region = 67 }
 0x3c1   :  { %1930 = vsyncpa [#allocation3], 1 }
 0x3c2   :  { %1932 = vsyncpa [#allocation3 + $0x1], 1 }

</bundles_post_ra>
